<compile_context>
chip_gen: v7x
topology: tpu7x:2x2x1
jax: 0.10.0
libtpu: 0.0.40
codegen_flags: <defaults>
</compile_context>

<pallas_src>
import math
import functools

import jax
import jax.numpy as jnp
from jax import lax
from jax.experimental import pallas as pl
from jax.experimental.pallas import tpu as pltpu


# ----------------------------------------------------------------------------------
# Host-side helpers
# ----------------------------------------------------------------------------------

def _default_vmem_limit_bytes():
    """Scoped VMEM budget derived from the device instead of a hard-coded 32 MiB."""
    cap = 128 * 1024 * 1024
    try:
        cap = int(pltpu.get_tpu_info().vmem_capacity_bytes)
    except Exception:
        pass
    # Leave headroom for Mosaic-internal scratch; clamp to a sane range.
    return int(max(32 * 1024 * 1024, min(cap * 3 // 4, 100 * 1024 * 1024)))


def _default_q_tile():
    """tq=256 matches the 256-wide MXUs on v6e/v7x; v5e's 128-wide MXU only needs 128."""
    try:
        kind = jax.devices()[0].device_kind.lower()
        if "v5 lite" in kind or "v5e" in kind or "v5litepod" in kind:
            return 128
    except Exception:
        pass
    return 256


def _choose_q_tile(seq_len, q_tile):
    tq = min(q_tile, seq_len)
    # Multi-tile needs tq | seq_len and 16-row alignment (bf16 sublane tiling) for the
    # dynamic row slices; otherwise fall back to a single full-sequence tile.
    if seq_len % tq != 0 or (tq != seq_len and tq % 16 != 0):
        tq = seq_len
    return tq


def _pack_self_params(params, *, d_k):
    """Fold 1/sqrt(d_k) into Wq/bq, fuse Wk|Wv, cast weights to bf16 (biases stay f32).
    In real use this packing is done once and cached with the parameters."""
    scale = 1.0 / math.sqrt(d_k)
    wq = (params["wq"] * scale).astype(jnp.bfloat16)
    bq = (params["bq"] * scale).astype(jnp.float32)
    wkv = jnp.concatenate([params["wk"], params["wv"]], axis=1).astype(jnp.bfloat16)
    bkv = jnp.concatenate([params["bk"], params["bv"]], axis=1).astype(jnp.float32)
    wo = params["wo"].astype(jnp.bfloat16)
    bo = params["bo"].astype(jnp.float32)
    return wq, bq, wkv, bkv, wo, bo


def _pack_general_params(params, *, d_k):
    scale = 1.0 / math.sqrt(d_k)
    return (
        (params["wq"] * scale).astype(jnp.bfloat16),
        (params["bq"] * scale).astype(jnp.float32),
        params["wk"].astype(jnp.bfloat16), params["bk"].astype(jnp.float32),
        params["wv"].astype(jnp.bfloat16), params["bv"].astype(jnp.float32),
        params["wo"].astype(jnp.bfloat16), params["bo"].astype(jnp.float32),
    )


# ----------------------------------------------------------------------------------
# In-kernel attention core (shared by both kernels)
# ----------------------------------------------------------------------------------

def _attention_core(q_all, k_all, v_all, wo, bo, *, h, d_k, out_dtype):
    """Per-head attention over lane-packed projections (no d_k padding, no transposes).

    q_all: (tq, h*d_k) bf16 (1/sqrt(d_k) already folded into the Q projection)
    k_all, v_all: (S, h*d_k) bf16
    wo: (h*d_k, D) bf16 ; bo: (1, D) f32
    Head h occupies lanes [h*d_k, (h+1)*d_k); the output projection is accumulated
    per head from Wo row slices, so the head concat never materializes.
    """
    tq = q_all.shape[0]
    d_out = wo.shape[1]
    acc = jnp.zeros((tq, d_out), jnp.float32)
    for head in range(h):
        lo = head * d_k
        q_h = q_all[:, lo:lo + d_k]                       # (tq, d_k)
        k_h = k_all[:, lo:lo + d_k]                       # (S,  d_k)
        v_h = v_all[:, lo:lo + d_k]                       # (S,  d_k)
        # scores = q_h @ k_h^T without materializing K^T (contract both minor dims).
        s = lax.dot_general(q_h, k_h, (((1,), (1,)), ((), ())),
                            preferred_element_type=jnp.float32)       # (tq, S) f32
        s = s - jnp.max(s, axis=-1, keepdims=True)
        p = jnp.exp(s)
        p = p * pl.reciprocal(jnp.sum(p, axis=-1, keepdims=True), approx=True)
        ctx = jnp.dot(p.astype(jnp.bfloat16), v_h,
                      preferred_element_type=jnp.float32)             # (tq, d_k)
        acc = acc + jnp.dot(ctx.astype(jnp.bfloat16), wo[lo:lo + d_k, :],
                            preferred_element_type=jnp.float32)       # (tq, D)
    return (acc + bo).astype(out_dtype)


# ----------------------------------------------------------------------------------
# Kernels
# ----------------------------------------------------------------------------------

def _mha_self_kernel(seq_ref, wq_ref, bq_ref, wkv_ref, bkv_ref, wo_ref, bo_ref,
                     o_ref, kv_ref, *, h, d_k, tq):
    """Self-attention: one input sequence, fused K|V projection, per-batch KV scratch."""
    D = h * d_k
    t = pl.program_id(1)
    row0 = pl.multiple_of(t * tq, tq)

    # Q rows for this tile come straight from the resident full-S input block
    # (sequence DMA'd once per batch element; no separate q input). Issued before the
    # t==0 block so the MXU has independent work while the KV scratch stores retire.
    x_tile = seq_ref[pl.ds(row0, tq), :].astype(jnp.bfloat16)
    q_all = (jnp.dot(x_tile, wq_ref[...], preferred_element_type=jnp.float32)
             + bq_ref[...]).astype(jnp.bfloat16)

    # Fused K|V projection: once per batch element, reused by every q tile.
    @pl.when(t == 0)
    def _():
        x = seq_ref[...].astype(jnp.bfloat16)
        kv = jnp.dot(x, wkv_ref[...], preferred_element_type=jnp.float32) + bkv_ref[...]
        kv_ref[0] = kv[:, :D].astype(kv_ref.dtype)
        kv_ref[1] = kv[:, D:].astype(kv_ref.dtype)

    o_ref[...] = _attention_core(q_all, kv_ref[0], kv_ref[1], wo_ref[...], bo_ref[...],
                                 h=h, d_k=d_k, out_dtype=o_ref.dtype)


def _mha_general_kernel(q_ref, k_ref, v_ref,
                        wq_ref, bq_ref, wk_ref, bk_ref, wv_ref, bv_ref,
                        wo_ref, bo_ref, o_ref, kv_ref, *, h, d_k):
    """General path: distinct query/key/value inputs."""
    # Q projection first: independent MXU work that overlaps the t==0 K/V build.
    q_all = (jnp.dot(q_ref[...].astype(jnp.bfloat16), wq_ref[...],
                     preferred_element_type=jnp.float32) + bq_ref[...]).astype(jnp.bfloat16)

    @pl.when(pl.program_id(1) == 0)
    def _():
        k_all = jnp.dot(k_ref[...].astype(jnp.bfloat16), wk_ref[...],
                        preferred_element_type=jnp.float32) + bk_ref[...]
        v_all = jnp.dot(v_ref[...].astype(jnp.bfloat16), wv_ref[...],
                        preferred_element_type=jnp.float32) + bv_ref[...]
        kv_ref[0] = k_all.astype(kv_ref.dtype)
        kv_ref[1] = v_all.astype(kv_ref.dtype)

    o_ref[...] = _attention_core(q_all, kv_ref[0], kv_ref[1], wo_ref[...], bo_ref[...],
                                 h=h, d_k=d_k, out_dtype=o_ref.dtype)


# ----------------------------------------------------------------------------------
# pallas_call wrappers
# ----------------------------------------------------------------------------------

def _self_attention_call(x, params, *, h, d_k, tq, n_qt):
    B, S, D = x.shape
    wq, bq, wkv, bkv, wo, bo = _pack_self_params(params, d_k=d_k)

    seq_spec = pl.BlockSpec((None, S, D), lambda b, t: (b, 0, 0))
    out_spec = pl.BlockSpec((None, tq, D), lambda b, t: (b, t, 0))
    const = lambda shape: pl.BlockSpec(shape, lambda b, t: (0, 0))

    cost = pl.CostEstimate(
        flops=int(B * (8 * S * D * D + 4 * S * S * D)),
        transcendentals=int(B * h * S * S),
        bytes_accessed=int(8 * B * S * D + 2 * 4 * D * D + 4 * 4 * D))

    return pl.pallas_call(
        functools.partial(_mha_self_kernel, h=h, d_k=d_k, tq=tq),
        out_shape=jax.ShapeDtypeStruct((B, S, D), x.dtype),
        grid_spec=pltpu.PrefetchScalarGridSpec(
            num_scalar_prefetch=0,
            grid=(B, n_qt),
            in_specs=[seq_spec,
                      const((D, D)), const((1, D)),
                      const((D, 2 * D)), const((1, 2 * D)),
                      const((D, D)), const((1, D))],
            out_specs=out_spec,
            scratch_shapes=[pltpu.VMEM((2, S, D), jnp.bfloat16)],   # projected K, V
        ),
        compiler_params=pltpu.CompilerParams(
            # batch axis shards across TensorCores; the q-tile axis must stay
            # "arbitrary" because the KV scratch is built at t==0 and reused.
            dimension_semantics=("parallel", "arbitrary"),
            vmem_limit_bytes=_default_vmem_limit_bytes(),
        ),
        cost_estimate=cost,
    )(x, wq, bq, wkv, bkv, wo, bo)


def _general_attention_call(query, key, value, params, *, h, d_k, tq, n_qt):
    B, Sq, D = query.shape
    _, Skv, _ = key.shape
    assert key.shape == value.shape, "key and value must share a shape"
    packed = _pack_general_params(params, d_k=d_k)

    q_spec = pl.BlockSpec((None, tq, D), lambda b, t: (b, t, 0))
    kv_spec = pl.BlockSpec((None, Skv, D), lambda b, t: (b, 0, 0))
    out_spec = pl.BlockSpec((None, tq, D), lambda b, t: (b, t, 0))
    w_spec = pl.BlockSpec((D, D), lambda b, t: (0, 0))
    b_spec = pl.BlockSpec((1, D), lambda b, t: (0, 0))

    cost = pl.CostEstimate(
        flops=int(B * (4 * Sq * D * D + 4 * Skv * D * D + 4 * Sq * Skv * D)),
        transcendentals=int(B * h * Sq * Skv),
        bytes_accessed=int(4 * B * (2 * Sq + 2 * Skv) * D + 4 * 2 * D * D + 4 * 4 * D))

    return pl.pallas_call(
        functools.partial(_mha_general_kernel, h=h, d_k=d_k),
        out_shape=jax.ShapeDtypeStruct((B, Sq, D), query.dtype),
        grid_spec=pltpu.PrefetchScalarGridSpec(
            num_scalar_prefetch=0,
            grid=(B, n_qt),
            in_specs=[q_spec, kv_spec, kv_spec,
                      w_spec, b_spec, w_spec, b_spec, w_spec, b_spec,
                      w_spec, b_spec],
            out_specs=out_spec,
            scratch_shapes=[pltpu.VMEM((2, Skv, D), jnp.bfloat16)],  # projected K, V
        ),
        compiler_params=pltpu.CompilerParams(
            dimension_semantics=("parallel", "arbitrary"),
            vmem_limit_bytes=_default_vmem_limit_bytes(),
        ),
        cost_estimate=cost,
    )(query, key, value, *packed)


def multi_headed_attention(query, key, value, params, *, h, q_tile=None):
    """Pallas forward of MultiHeadedAttention (eval mode, mask=None).

    query/key/value: (B, S, d_model) arrays.  params: wq,bq,wk,bk,wv,bv,wo,bo with
    weights stored as (d_in, d_out) (= PyTorch weight.T) and biases as (1, d_out).
    """
    B, Sq, D = query.shape
    assert D % h == 0, "d_model must be divisible by h"
    d_k = D // h
    if q_tile is None:
        q_tile = _default_q_tile()
    tq = _choose_q_tile(Sq, q_tile)
    n_qt = Sq // tq

    if query is key and key is value:
        # Self-attention (the module's use in the strided transformer encoder):
        # dedup the input sequence and fuse the K|V projection.
        return _self_attention_call(query, params, h=h, d_k=d_k, tq=tq, n_qt=n_qt)
    return _general_attention_call(query, key, value, params, h=h, d_k=d_k, tq=tq, n_qt=n_qt)


# ----------------------------------------------------------------------------------
# Pure-JAX reference (mirrors the PyTorch forward, eval mode, mask=None)
# ----------------------------------------------------------------------------------

def _reference_mha(query, key, value, params, *, h):
    B, S, D = query.shape
    d_k = D // h

    def lin(x, w, b):
        return x @ w + b

    def split(x):
        return x.reshape(B, -1, h, d_k).transpose(0, 2, 1, 3)

    Q = split(lin(query, params["wq"], params["bq"]))
    K = split(lin(key, params["wk"], params["bk"]))
    V = split(lin(value, params["wv"], params["bv"]))

    scores = jnp.einsum("bhqd,bhkd->bhqk", Q, K) / math.sqrt(d_k)
    p = jax.nn.softmax(scores, axis=-1)
    x = jnp.einsum("bhqk,bhkd->bhqd", p, V)
    x = x.transpose(0, 2, 1, 3).reshape(B, -1, D)
    return lin(x, params["wo"], params["bo"])


def _init_params(key, d_model):
    """Deterministic synthetic parameters for the 4 nn.Linear(d_model, d_model) layers."""
    keys = jax.random.split(key, 8)
    bound = 1.0 / math.sqrt(d_model)

    def w(k):  # stored as (d_in, d_out) == PyTorch weight transposed
        return jax.random.uniform(k, (d_model, d_model), jnp.float32, -bound, bound)

    def b(k):
        return jax.random.uniform(k, (1, d_model), jnp.float32, -bound, bound)

    return {
        "wq": w(keys[0]), "bq": b(keys[1]),
        "wk": w(keys[2]), "bk": b(keys[3]),
        "wv": w(keys[4]), "bv": b(keys[5]),
        "wo": w(keys[6]), "bo": b(keys[7]),
    }


if __name__ == "__main__":
    B, S, d_model, h = 2, 32, 32, 4

    root = jax.random.PRNGKey(0)
    kx, kq, kk, kv, kp = jax.random.split(root, 5)
    params = _init_params(kp, d_model)

    # 1) Self-attention (the module's typical call: forward(x, x, x)); q_tile=16 forces
    #    two q tiles so the per-batch KV-scratch reuse path is exercised.
    x = jax.random.normal(kx, (B, S, d_model), jnp.float32)
    out_self = jax.block_until_ready(
        multi_headed_attention(x, x, x, params, h=h, q_tile=16))
    ref_self = _reference_mha(x, x, x, params, h=h)
    assert out_self.shape == (B, S, d_model)
    assert jnp.allclose(out_self, ref_self, atol=5e-2, rtol=5e-2), \
        "self-attention mismatch vs reference"

    # 2) Distinct query/key/value (general path).
    q = jax.random.normal(kq, (B, S, d_model), jnp.float32)
    k = jax.random.normal(kk, (B, S, d_model), jnp.float32)
    v = jax.random.normal(kv, (B, S, d_model), jnp.float32)
    out_gen = jax.block_until_ready(multi_headed_attention(q, k, v, params, h=h))
    ref_gen = _reference_mha(q, k, v, params, h=h)
    assert out_gen.shape == (B, S, d_model)
    assert jnp.allclose(out_gen, ref_gen, atol=5e-2, rtol=5e-2), \
        "general attention mismatch vs reference"

    print("KERNEL_OK")
</pallas_src>

<mosaic_0001>
module attributes {stable_mosaic.version = 11 : i64} {
  func.func @_mha_self_kernel(%arg0: i32, %arg1: i32, %arg2: memref<1x32x32xf32, #tpu.memory_space<vmem>>, %arg3: memref<32x32xbf16, #tpu.memory_space<vmem>>, %arg4: memref<1x32xf32, #tpu.memory_space<vmem>>, %arg5: memref<32x64xbf16, #tpu.memory_space<vmem>>, %arg6: memref<1x64xf32, #tpu.memory_space<vmem>>, %arg7: memref<32x32xbf16, #tpu.memory_space<vmem>>, %arg8: memref<1x32xf32, #tpu.memory_space<vmem>>, %arg9: memref<1x16x32xf32, #tpu.memory_space<vmem>>, %arg10: memref<2x32x32xbf16, #tpu.memory_space<vmem>>) attributes {dimension_semantics = [#tpu.dimension_semantics<parallel>, #tpu.dimension_semantics<arbitrary>], iteration_bounds = array<i64: 2, 2>, scalar_prefetch = 0 : i64, scratch_operands = 1 : i64, tpu.core_type = #tpu.core_type<tc>, window_params = [{transform_indices = @transform_0, window_bounds = array<i64: 1, 32, 32>}, {pipeline_mode = #tpu.pipeline_mode<synchronous>, transform_indices = @transform_1, window_bounds = array<i64: 32, 32>}, {pipeline_mode = #tpu.pipeline_mode<synchronous>, transform_indices = @transform_2, window_bounds = array<i64: 1, 32>}, {pipeline_mode = #tpu.pipeline_mode<synchronous>, transform_indices = @transform_3, window_bounds = array<i64: 32, 64>}, {pipeline_mode = #tpu.pipeline_mode<synchronous>, transform_indices = @transform_4, window_bounds = array<i64: 1, 64>}, {pipeline_mode = #tpu.pipeline_mode<synchronous>, transform_indices = @transform_5, window_bounds = array<i64: 32, 32>}, {pipeline_mode = #tpu.pipeline_mode<synchronous>, transform_indices = @transform_6, window_bounds = array<i64: 1, 32>}, {transform_indices = @transform_7, window_bounds = array<i64: 1, 16, 32>}]} {
    %c16_i32 = arith.constant 16 : i32
    %0 = arith.muli %arg1, %c16_i32 : i32
    %1 = tpu.assume_multiple %0, 16 : i32
    %c0 = arith.constant 0 : index
    %2 = arith.index_cast %1 : i32 to index
    %c0_0 = arith.constant 0 : index
    %3 = vector.load %arg2[%c0, %2, %c0_0] : memref<1x32x32xf32, #tpu.memory_space<vmem>>, vector<1x16x32xf32>
    %4 = vector.shape_cast %3 : vector<1x16x32xf32> to vector<16x32xf32>
    %5 = arith.truncf %4 : vector<16x32xf32> to vector<16x32xbf16>
    %c0_1 = arith.constant 0 : index
    %c0_2 = arith.constant 0 : index
    %6 = vector.load %arg3[%c0_1, %c0_2] : memref<32x32xbf16, #tpu.memory_space<vmem>>, vector<32x32xbf16>
    %cst = arith.constant dense<0.000000e+00> : vector<16x32xf32>
    %7 = tpu.matmul %5, %6, %cst {dimension_numbers = #tpu.dot_dimension_numbers<[1], [0], [0], [1], [0, 0, 1, 1], [], []>} : vector<16x32xbf16>, vector<32x32xbf16>, vector<16x32xf32> -> vector<16x32xf32>
    %c0_3 = arith.constant 0 : index
    %c0_4 = arith.constant 0 : index
    %8 = vector.load %arg4[%c0_3, %c0_4] : memref<1x32xf32, #tpu.memory_space<vmem>>, vector<1x32xf32>
    %9 = vector.broadcast %8 : vector<1x32xf32> to vector<16x32xf32>
    %10 = arith.addf %7, %9 : vector<16x32xf32>
    %11 = arith.truncf %10 : vector<16x32xf32> to vector<16x32xbf16>
    %c0_i32 = arith.constant 0 : i32
    %12 = arith.cmpi eq, %arg1, %c0_i32 : i32
    %13 = arith.extui %12 : i1 to i32
    %c0_i32_5 = arith.constant 0 : i32
    %14 = arith.cmpi ne, %13, %c0_i32_5 : i32
    scf.if %14 {
      %c0_39 = arith.constant 0 : index
      %c0_40 = arith.constant 0 : index
      %c0_41 = arith.constant 0 : index
      %107 = vector.load %arg2[%c0_39, %c0_40, %c0_41] : memref<1x32x32xf32, #tpu.memory_space<vmem>>, vector<1x32x32xf32>
      %108 = vector.shape_cast %107 : vector<1x32x32xf32> to vector<32x32xf32>
      %109 = arith.truncf %108 : vector<32x32xf32> to vector<32x32xbf16>
      %c0_42 = arith.constant 0 : index
      %c0_43 = arith.constant 0 : index
      %110 = vector.load %arg5[%c0_42, %c0_43] : memref<32x64xbf16, #tpu.memory_space<vmem>>, vector<32x64xbf16>
      %cst_44 = arith.constant dense<0.000000e+00> : vector<32x64xf32>
      %111 = tpu.matmul %109, %110, %cst_44 {dimension_numbers = #tpu.dot_dimension_numbers<[1], [0], [0], [1], [0, 0, 1, 1], [], []>} : vector<32x32xbf16>, vector<32x64xbf16>, vector<32x64xf32> -> vector<32x64xf32>
      %c0_45 = arith.constant 0 : index
      %c0_46 = arith.constant 0 : index
      %112 = vector.load %arg6[%c0_45, %c0_46] : memref<1x64xf32, #tpu.memory_space<vmem>>, vector<1x64xf32>
      %113 = vector.broadcast %112 : vector<1x64xf32> to vector<32x64xf32>
      %114 = arith.addf %111, %113 : vector<32x64xf32>
      %115 = vector.extract_strided_slice %114 {offsets = [0, 0], sizes = [32, 32], strides = [1, 1]} : vector<32x64xf32> to vector<32x32xf32>
      %116 = arith.truncf %115 : vector<32x32xf32> to vector<32x32xbf16>
      %c0_47 = arith.constant 0 : index
      %c0_48 = arith.constant 0 : index
      %c0_49 = arith.constant 0 : index
      %117 = vector.load %arg10[%c0_47, %c0_48, %c0_49] : memref<2x32x32xbf16, #tpu.memory_space<vmem>>, vector<1x32x32xbf16>
      %118 = vector.shape_cast %117 : vector<1x32x32xbf16> to vector<32x32xbf16>
      %119 = vector.shape_cast %116 : vector<32x32xbf16> to vector<1x32x32xbf16>
      tpu.vector_store %arg10[%c0_47, %c0_48, %c0_49], %119 {strides = array<i32>} : memref<2x32x32xbf16, #tpu.memory_space<vmem>>, vector<1x32x32xbf16>,
      %120 = vector.extract_strided_slice %114 {offsets = [0, 32], sizes = [32, 32], strides = [1, 1]} : vector<32x64xf32> to vector<32x32xf32>
      %121 = arith.truncf %120 : vector<32x32xf32> to vector<32x32xbf16>
      %c1_50 = arith.constant 1 : index
      %c0_51 = arith.constant 0 : index
      %c0_52 = arith.constant 0 : index
      %122 = vector.load %arg10[%c1_50, %c0_51, %c0_52] : memref<2x32x32xbf16, #tpu.memory_space<vmem>>, vector<1x32x32xbf16>
      %123 = vector.shape_cast %122 : vector<1x32x32xbf16> to vector<32x32xbf16>
      %124 = vector.shape_cast %121 : vector<32x32xbf16> to vector<1x32x32xbf16>
      tpu.vector_store %arg10[%c1_50, %c0_51, %c0_52], %124 {strides = array<i32>} : memref<2x32x32xbf16, #tpu.memory_space<vmem>>, vector<1x32x32xbf16>,
    } else {
    }
    %c0_6 = arith.constant 0 : index
    %c0_7 = arith.constant 0 : index
    %c0_8 = arith.constant 0 : index
    %15 = vector.load %arg10[%c0_6, %c0_7, %c0_8] : memref<2x32x32xbf16, #tpu.memory_space<vmem>>, vector<1x32x32xbf16>
    %16 = vector.shape_cast %15 : vector<1x32x32xbf16> to vector<32x32xbf16>
    %c1 = arith.constant 1 : index
    %c0_9 = arith.constant 0 : index
    %c0_10 = arith.constant 0 : index
    %17 = vector.load %arg10[%c1, %c0_9, %c0_10] : memref<2x32x32xbf16, #tpu.memory_space<vmem>>, vector<1x32x32xbf16>
    %18 = vector.shape_cast %17 : vector<1x32x32xbf16> to vector<32x32xbf16>
    %c0_11 = arith.constant 0 : index
    %c0_12 = arith.constant 0 : index
    %19 = vector.load %arg7[%c0_11, %c0_12] : memref<32x32xbf16, #tpu.memory_space<vmem>>, vector<32x32xbf16>
    %c0_13 = arith.constant 0 : index
    %c0_14 = arith.constant 0 : index
    %20 = vector.load %arg8[%c0_13, %c0_14] : memref<1x32xf32, #tpu.memory_space<vmem>>, vector<1x32xf32>
    %cst_15 = arith.constant 0.000000e+00 : f32
    %21 = vector.broadcast %cst_15 : f32 to vector<16x32xf32>
    %22 = vector.extract_strided_slice %11 {offsets = [0, 0], sizes = [16, 8], strides = [1, 1]} : vector<16x32xbf16> to vector<16x8xbf16>
    %23 = vector.extract_strided_slice %16 {offsets = [0, 0], sizes = [32, 8], strides = [1, 1]} : vector<32x32xbf16> to vector<32x8xbf16>
    %24 = vector.extract_strided_slice %18 {offsets = [0, 0], sizes = [32, 8], strides = [1, 1]} : vector<32x32xbf16> to vector<32x8xbf16>
    %cst_16 = arith.constant dense<0.000000e+00> : vector<16x32xf32>
    %25 = tpu.matmul %22, %23, %cst_16 {dimension_numbers = #tpu.dot_dimension_numbers<[1], [1], [0], [0], [0, 0, 1, 0], [], []>} : vector<16x8xbf16>, vector<32x8xbf16>, vector<16x32xf32> -> vector<16x32xf32>
    %cst_17 = arith.constant dense<0xFF800000> : vector<16xf32>
    %26 = vector.multi_reduction <maximumf>, %25, %cst_17 [1] : vector<16x32xf32> to vector<16xf32>
    %27 = vector.shape_cast %26 : vector<16xf32> to vector<16x1xf32>
    %28 = vector.broadcast %27 : vector<16x1xf32> to vector<16x32xf32>
    %29 = arith.subf %25, %28 : vector<16x32xf32>
    %30 = math.exp %29 : vector<16x32xf32>
    %cst_18 = arith.constant dense<0.000000e+00> : vector<16xf32>
    %31 = vector.multi_reduction <add>, %30, %cst_18 [1] : vector<16x32xf32> to vector<16xf32>
    %32 = vector.shape_cast %31 : vector<16xf32> to vector<16x1xf32>
    %33 = tpu.reciprocal %32 {approx = true} : vector<16x1xf32> -> vector<16x1xf32>
    %34 = vector.broadcast %33 : vector<16x1xf32> to vector<16x32xf32>
    %35 = arith.mulf %30, %34 : vector<16x32xf32>
    %36 = arith.truncf %35 : vector<16x32xf32> to vector<16x32xbf16>
    %cst_19 = arith.constant dense<0.000000e+00> : vector<16x8xf32>
    %37 = tpu.matmul %36, %24, %cst_19 {dimension_numbers = #tpu.dot_dimension_numbers<[1], [0], [0], [1], [0, 0, 1, 1], [], []>} : vector<16x32xbf16>, vector<32x8xbf16>, vector<16x8xf32> -> vector<16x8xf32>
    %38 = arith.truncf %37 : vector<16x8xf32> to vector<16x8xbf16>
    %39 = vector.extract_strided_slice %19 {offsets = [0, 0], sizes = [8, 32], strides = [1, 1]} : vector<32x32xbf16> to vector<8x32xbf16>
    %cst_20 = arith.constant dense<0.000000e+00> : vector<16x32xf32>
    %40 = tpu.matmul %38, %39, %cst_20 {dimension_numbers = #tpu.dot_dimension_numbers<[1], [0], [0], [1], [0, 0, 1, 1], [], []>} : vector<16x8xbf16>, vector<8x32xbf16>, vector<16x32xf32> -> vector<16x32xf32>
    %41 = arith.addf %21, %40 : vector<16x32xf32>
    %42 = vector.extract_strided_slice %11 {offsets = [0, 8], sizes = [16, 8], strides = [1, 1]} : vector<16x32xbf16> to vector<16x8xbf16>
    %43 = vector.extract_strided_slice %16 {offsets = [0, 8], sizes = [32, 8], strides = [1, 1]} : vector<32x32xbf16> to vector<32x8xbf16>
    %44 = vector.extract_strided_slice %18 {offsets = [0, 8], sizes = [32, 8], strides = [1, 1]} : vector<32x32xbf16> to vector<32x8xbf16>
    %cst_21 = arith.constant dense<0.000000e+00> : vector<16x32xf32>
    %45 = tpu.matmul %42, %43, %cst_21 {dimension_numbers = #tpu.dot_dimension_numbers<[1], [1], [0], [0], [0, 0, 1, 0], [], []>} : vector<16x8xbf16>, vector<32x8xbf16>, vector<16x32xf32> -> vector<16x32xf32>
    %cst_22 = arith.constant dense<0xFF800000> : vector<16xf32>
    %46 = vector.multi_reduction <maximumf>, %45, %cst_22 [1] : vector<16x32xf32> to vector<16xf32>
    %47 = vector.shape_cast %46 : vector<16xf32> to vector<16x1xf32>
    %48 = vector.broadcast %47 : vector<16x1xf32> to vector<16x32xf32>
    %49 = arith.subf %45, %48 : vector<16x32xf32>
    %50 = math.exp %49 : vector<16x32xf32>
    %cst_23 = arith.constant dense<0.000000e+00> : vector<16xf32>
    %51 = vector.multi_reduction <add>, %50, %cst_23 [1] : vector<16x32xf32> to vector<16xf32>
    %52 = vector.shape_cast %51 : vector<16xf32> to vector<16x1xf32>
    %53 = tpu.reciprocal %52 {approx = true} : vector<16x1xf32> -> vector<16x1xf32>
    %54 = vector.broadcast %53 : vector<16x1xf32> to vector<16x32xf32>
    %55 = arith.mulf %50, %54 : vector<16x32xf32>
    %56 = arith.truncf %55 : vector<16x32xf32> to vector<16x32xbf16>
    %cst_24 = arith.constant dense<0.000000e+00> : vector<16x8xf32>
    %57 = tpu.matmul %56, %44, %cst_24 {dimension_numbers = #tpu.dot_dimension_numbers<[1], [0], [0], [1], [0, 0, 1, 1], [], []>} : vector<16x32xbf16>, vector<32x8xbf16>, vector<16x8xf32> -> vector<16x8xf32>
    %58 = arith.truncf %57 : vector<16x8xf32> to vector<16x8xbf16>
    %59 = vector.extract_strided_slice %19 {offsets = [8, 0], sizes = [8, 32], strides = [1, 1]} : vector<32x32xbf16> to vector<8x32xbf16>
    %cst_25 = arith.constant dense<0.000000e+00> : vector<16x32xf32>
    %60 = tpu.matmul %58, %59, %cst_25 {dimension_numbers = #tpu.dot_dimension_numbers<[1], [0], [0], [1], [0, 0, 1, 1], [], []>} : vector<16x8xbf16>, vector<8x32xbf16>, vector<16x32xf32> -> vector<16x32xf32>
    %61 = arith.addf %41, %60 : vector<16x32xf32>
    %62 = vector.extract_strided_slice %11 {offsets = [0, 16], sizes = [16, 8], strides = [1, 1]} : vector<16x32xbf16> to vector<16x8xbf16>
    %63 = vector.extract_strided_slice %16 {offsets = [0, 16], sizes = [32, 8], strides = [1, 1]} : vector<32x32xbf16> to vector<32x8xbf16>
    %64 = vector.extract_strided_slice %18 {offsets = [0, 16], sizes = [32, 8], strides = [1, 1]} : vector<32x32xbf16> to vector<32x8xbf16>
    %cst_26 = arith.constant dense<0.000000e+00> : vector<16x32xf32>
    %65 = tpu.matmul %62, %63, %cst_26 {dimension_numbers = #tpu.dot_dimension_numbers<[1], [1], [0], [0], [0, 0, 1, 0], [], []>} : vector<16x8xbf16>, vector<32x8xbf16>, vector<16x32xf32> -> vector<16x32xf32>
    %cst_27 = arith.constant dense<0xFF800000> : vector<16xf32>
    %66 = vector.multi_reduction <maximumf>, %65, %cst_27 [1] : vector<16x32xf32> to vector<16xf32>
    %67 = vector.shape_cast %66 : vector<16xf32> to vector<16x1xf32>
    %68 = vector.broadcast %67 : vector<16x1xf32> to vector<16x32xf32>
    %69 = arith.subf %65, %68 : vector<16x32xf32>
    %70 = math.exp %69 : vector<16x32xf32>
    %cst_28 = arith.constant dense<0.000000e+00> : vector<16xf32>
    %71 = vector.multi_reduction <add>, %70, %cst_28 [1] : vector<16x32xf32> to vector<16xf32>
    %72 = vector.shape_cast %71 : vector<16xf32> to vector<16x1xf32>
    %73 = tpu.reciprocal %72 {approx = true} : vector<16x1xf32> -> vector<16x1xf32>
    %74 = vector.broadcast %73 : vector<16x1xf32> to vector<16x32xf32>
    %75 = arith.mulf %70, %74 : vector<16x32xf32>
    %76 = arith.truncf %75 : vector<16x32xf32> to vector<16x32xbf16>
    %cst_29 = arith.constant dense<0.000000e+00> : vector<16x8xf32>
    %77 = tpu.matmul %76, %64, %cst_29 {dimension_numbers = #tpu.dot_dimension_numbers<[1], [0], [0], [1], [0, 0, 1, 1], [], []>} : vector<16x32xbf16>, vector<32x8xbf16>, vector<16x8xf32> -> vector<16x8xf32>
    %78 = arith.truncf %77 : vector<16x8xf32> to vector<16x8xbf16>
    %79 = vector.extract_strided_slice %19 {offsets = [16, 0], sizes = [8, 32], strides = [1, 1]} : vector<32x32xbf16> to vector<8x32xbf16>
    %cst_30 = arith.constant dense<0.000000e+00> : vector<16x32xf32>
    %80 = tpu.matmul %78, %79, %cst_30 {dimension_numbers = #tpu.dot_dimension_numbers<[1], [0], [0], [1], [0, 0, 1, 1], [], []>} : vector<16x8xbf16>, vector<8x32xbf16>, vector<16x32xf32> -> vector<16x32xf32>
    %81 = arith.addf %61, %80 : vector<16x32xf32>
    %82 = vector.extract_strided_slice %11 {offsets = [0, 24], sizes = [16, 8], strides = [1, 1]} : vector<16x32xbf16> to vector<16x8xbf16>
    %83 = vector.extract_strided_slice %16 {offsets = [0, 24], sizes = [32, 8], strides = [1, 1]} : vector<32x32xbf16> to vector<32x8xbf16>
    %84 = vector.extract_strided_slice %18 {offsets = [0, 24], sizes = [32, 8], strides = [1, 1]} : vector<32x32xbf16> to vector<32x8xbf16>
    %cst_31 = arith.constant dense<0.000000e+00> : vector<16x32xf32>
    %85 = tpu.matmul %82, %83, %cst_31 {dimension_numbers = #tpu.dot_dimension_numbers<[1], [1], [0], [0], [0, 0, 1, 0], [], []>} : vector<16x8xbf16>, vector<32x8xbf16>, vector<16x32xf32> -> vector<16x32xf32>
    %cst_32 = arith.constant dense<0xFF800000> : vector<16xf32>
    %86 = vector.multi_reduction <maximumf>, %85, %cst_32 [1] : vector<16x32xf32> to vector<16xf32>
    %87 = vector.shape_cast %86 : vector<16xf32> to vector<16x1xf32>
    %88 = vector.broadcast %87 : vector<16x1xf32> to vector<16x32xf32>
    %89 = arith.subf %85, %88 : vector<16x32xf32>
    %90 = math.exp %89 : vector<16x32xf32>
    %cst_33 = arith.constant dense<0.000000e+00> : vector<16xf32>
    %91 = vector.multi_reduction <add>, %90, %cst_33 [1] : vector<16x32xf32> to vector<16xf32>
    %92 = vector.shape_cast %91 : vector<16xf32> to vector<16x1xf32>
    %93 = tpu.reciprocal %92 {approx = true} : vector<16x1xf32> -> vector<16x1xf32>
    %94 = vector.broadcast %93 : vector<16x1xf32> to vector<16x32xf32>
    %95 = arith.mulf %90, %94 : vector<16x32xf32>
    %96 = arith.truncf %95 : vector<16x32xf32> to vector<16x32xbf16>
    %cst_34 = arith.constant dense<0.000000e+00> : vector<16x8xf32>
    %97 = tpu.matmul %96, %84, %cst_34 {dimension_numbers = #tpu.dot_dimension_numbers<[1], [0], [0], [1], [0, 0, 1, 1], [], []>} : vector<16x32xbf16>, vector<32x8xbf16>, vector<16x8xf32> -> vector<16x8xf32>
    %98 = arith.truncf %97 : vector<16x8xf32> to vector<16x8xbf16>
    %99 = vector.extract_strided_slice %19 {offsets = [24, 0], sizes = [8, 32], strides = [1, 1]} : vector<32x32xbf16> to vector<8x32xbf16>
    %cst_35 = arith.constant dense<0.000000e+00> : vector<16x32xf32>
    %100 = tpu.matmul %98, %99, %cst_35 {dimension_numbers = #tpu.dot_dimension_numbers<[1], [0], [0], [1], [0, 0, 1, 1], [], []>} : vector<16x8xbf16>, vector<8x32xbf16>, vector<16x32xf32> -> vector<16x32xf32>
    %101 = arith.addf %81, %100 : vector<16x32xf32>
    %102 = vector.broadcast %20 : vector<1x32xf32> to vector<16x32xf32>
    %103 = arith.addf %101, %102 : vector<16x32xf32>
    %c0_36 = arith.constant 0 : index
    %c0_37 = arith.constant 0 : index
    %c0_38 = arith.constant 0 : index
    %104 = vector.load %arg9[%c0_36, %c0_37, %c0_38] : memref<1x16x32xf32, #tpu.memory_space<vmem>>, vector<1x16x32xf32>
    %105 = vector.shape_cast %104 : vector<1x16x32xf32> to vector<16x32xf32>
    %106 = vector.shape_cast %103 : vector<16x32xf32> to vector<1x16x32xf32>
    tpu.vector_store %arg9[%c0_36, %c0_37, %c0_38], %106 {strides = array<i32>} : memref<1x16x32xf32, #tpu.memory_space<vmem>>, vector<1x16x32xf32>,
    return
  }
  func.func @transform_0(%arg0: i32, %arg1: i32) -> (i32, i32, i32) {
    %c0_i32 = arith.constant 0 : i32
    %c0_i32_0 = arith.constant 0 : i32
    %c0_i32_1 = arith.constant 0 : i32
    return %arg0, %c0_i32, %c0_i32_0 : i32, i32, i32
  }
  func.func @transform_1(%arg0: i32, %arg1: i32) -> (i32, i32) {
    %c0_i32 = arith.constant 0 : i32
    %c0_i32_0 = arith.constant 0 : i32
    %c0_i32_1 = arith.constant 0 : i32
    return %c0_i32, %c0_i32_0 : i32, i32
  }
  func.func @transform_2(%arg0: i32, %arg1: i32) -> (i32, i32) {
    %c0_i32 = arith.constant 0 : i32
    %c0_i32_0 = arith.constant 0 : i32
    %c0_i32_1 = arith.constant 0 : i32
    return %c0_i32, %c0_i32_0 : i32, i32
  }
  func.func @transform_3(%arg0: i32, %arg1: i32) -> (i32, i32) {
    %c0_i32 = arith.constant 0 : i32
    %c0_i32_0 = arith.constant 0 : i32
    %c0_i32_1 = arith.constant 0 : i32
    return %c0_i32, %c0_i32_0 : i32, i32
  }
  func.func @transform_4(%arg0: i32, %arg1: i32) -> (i32, i32) {
    %c0_i32 = arith.constant 0 : i32
    %c0_i32_0 = arith.constant 0 : i32
    %c0_i32_1 = arith.constant 0 : i32
    return %c0_i32, %c0_i32_0 : i32, i32
  }
  func.func @transform_5(%arg0: i32, %arg1: i32) -> (i32, i32) {
    %c0_i32 = arith.constant 0 : i32
    %c0_i32_0 = arith.constant 0 : i32
    %c0_i32_1 = arith.constant 0 : i32
    return %c0_i32, %c0_i32_0 : i32, i32
  }
  func.func @transform_6(%arg0: i32, %arg1: i32) -> (i32, i32) {
    %c0_i32 = arith.constant 0 : i32
    %c0_i32_0 = arith.constant 0 : i32
    %c0_i32_1 = arith.constant 0 : i32
    return %c0_i32, %c0_i32_0 : i32, i32
  }
  func.func @transform_7(%arg0: i32, %arg1: i32) -> (i32, i32, i32) {
    %c0_i32 = arith.constant 0 : i32
    %c0_i32_0 = arith.constant 0 : i32
    return %arg0, %arg1, %c0_i32 : i32, i32, i32
  }
}

</mosaic_0001>

<bundles_post_ra>
// kernel: tpu_custom_call.1
= control target key start
LH: loop header
LB: loop body
LE: loop exit
PB: predicated region body
PF: predicated region fallthrough
CT: control target
= control target key end

     0   :  { %s2840_s0 = inlined_call_operand.hbm [shape: f32[2,32,32], index: 0, kind: input, shape index: {}]   ;;  %s2841_s1 = inlined_call_operand.hbm [shape: bf16[32,32], index: 1, kind: input, shape index: {}]   ;;  %s2842_s2 = inlined_call_operand.hbm [shape: f32[1,32], index: 2, kind: input, shape index: {}]   ;;  %s2843_s3 = inlined_call_operand.hbm [shape: bf16[32,64], index: 3, kind: input, shape index: {}]   ;;  %s2844_s4 = inlined_call_operand.hbm [shape: f32[1,64], index: 4, kind: input, shape index: {}]   ;;  %s2845_s5 = inlined_call_operand.hbm [shape: bf16[32,32], index: 5, kind: input, shape index: {}]   ;;  %s2846_s6 = inlined_call_operand.hbm [shape: f32[1,32], index: 6, kind: input, shape index: {}]   ;;  %s2847_s7 = inlined_call_operand.hbm [shape: f32[2,32,32], index: 7, kind: output, shape index: {}]  }
   0x1   :  { %2857 = sst [smem:[#allocation26_spill]] %s2840_s0 }
   0x2   :  { %2858 = sst [smem:[#allocation27_spill]] %s2841_s1 }
   0x3   :  { %2859 = sst [smem:[#allocation28_spill]] %s2842_s2 }
   0x4   :  { %2860 = sst [smem:[#allocation29_spill]] %s2843_s3 }
   0x5   :  { %2861 = sst [smem:[#allocation30_spill]] %s2847_s7 }
   0x6   :  { %12 = vsyncpa [#allocation4], 0 }
   0x7   :  { %14 = vsyncpa [#allocation4 + $0x1], 0 }
   0x8   :  { %15 = vsyncpa [#allocation7], 0 }
   0x9   :  { %16 = vsyncpa [#allocation10], 0 }
   0xa   :  { %17 = vsyncpa [#allocation13], 0 }
   0xb   :  { %18 = vsyncpa [#allocation5], 0 }
   0xc   :  { %20 = vsyncpa [#allocation5 + $0x1], 0  ;;  %s2261_s24 = smov 0   ;;  %s2263_s25 = smov 0  }
   0xd   :  { %s2265_s26 = smov 0   ;;  %s2267_s27 = smov 0  }
   0xe   :  { %s2269_s28 = smov 0   ;;  %s2271_s29 = smov 0  }
   0xf   :  { %s2273_s30 = smov 0   ;;  %s2275_s8 = smov 0  }
  0x10   :  { %s2277_s9 = smov 0   ;;  %s2279_s10 = smov 0  }
  0x11   :  { %s2281_s11 = smov 0  }
  0x12 LB: > { %2862 = sst [smem:[#allocation21_spill]] %s2159_s24  ;;  %s1460_s12 = sadd.s32 4294967295, %s2199_s11   ;;  %s2199_s11 = sphi %s2281_s11, %s26_s11   ;;  %s2195_s10 = sphi %s2279_s10, %s2904_s10   ;;  %s2191_s9 = sphi %s2277_s9, %s2903_s9   ;;  %s2187_s8 = sphi %s2275_s8, %s2902_s8   ;;  %s2183_s30 = sphi %s2273_s30, %s2901_s30   ;;  %s2179_s29 = sphi %s2271_s29, %s2900_s29   ;;  %s2175_s28 = sphi %s2269_s28, %s2899_s28   ;;  %s2171_s27 = sphi %s2267_s27, %s2898_s27   ;;  %s2167_s26 = sphi %s2265_s26, %s2897_s26   ;;  %s2163_s25 = sphi %s2263_s25, %s2896_s25   ;;  %s2159_s24 = sphi %s2261_s24, %s2895_s24  }
  0x13   : > { %2863 = sst [smem:[#allocation22_spill]] %s2183_s30  ;;  %p1462_p0 = scmp.ge.s32.totalorder %s2199_s11, 1 }
  0x14   : > { %2864 = sst [smem:[#allocation23_spill]] %s2187_s8  ;;  %p2318_p1 = scmp.eq.s32.totalorder %s1460_s12, 0 }
  0x15   : > { %p2322_p2 = scmp.eq.s32.totalorder %s1460_s12, 3  ;;  %p223_p3 = scmp.lt.s32.totalorder %s2199_s11, 5 }
  0x16   : > { %s2865_s13 = scalar_select %p2318_p1, 1, 0 }
  0x17   : > { %s2866_s14 = scalar_select %p2322_p2, 1, 0 }
  0x18   : > { %p2327_p4 = pnand %p1462_p0, %p223_p3  ;;  %s2201_s16 = smov [#allocation6]  }
  0x19   : > { %2867 = sst [smem:[#allocation24_spill]] %s2866_s14  ;;  %s235_s17 = sshll.u32 %s2201_s16, 4  ;;  %s2331_s17 = int_to_ptr.vmem [resolvable:$true] %s235_s17 }
  0x1a   : > { %s2868_s15 = scalar_select %p2327_p4, 1, 0 }
  0x1b   : > { %p1684_p5 = pneg %p2327_p4  ;;  %s2202_s19 = smov [#allocation9]  }
  0x1c   : > { %2869 = sst [smem:[#allocation25_spill]] %s2868_s15  ;;  %s259_s20 = sshll.u32 %s2202_s19, 4  ;;  %s2341_s20 = int_to_ptr.vmem [resolvable:$true] %s259_s20 }
  0x1d   : > { %p2337_p6 = pnand %p1684_p5, %p2318_p1  ;;  %s2203_s21 = smov [#allocation12]  }
  0x1e   : > { %s283_s22 = sshll.u32 %s2203_s21, 4  ;;  %s2871_s1 = sld [smem:[#allocation27_spill]]  ;;  %s2343_s22 = int_to_ptr.vmem [resolvable:$true] %s283_s22 }
  0x1f   : > { %p2353_p8 = pneg %p2337_p6 }
  0x24   : > { %s1867_s16 = scalar_lea.hbm %s2871_s1, 256 }
  0x25   : > { %p1868_p7 = scmp.ne.s32.totalorder %s2871_s1, %s1867_s16  ;;  %p1874_p11 = scmp.lt.u32.totalorder %s1867_s16, %s2871_s1 }
  0x27   : > { %p1870_p9 = pnand %p2353_p8, %p1868_p7 }
  0x29   : > { %p1871_p10 = pneg %p1870_p9 }
  0x2b   : > { %p1876_p12 = pnand %p1874_p11, %p1871_p10 }
  0x2d   : > { %1879 = shalt.err (!%p1876_p12)
}
  0x2e   : > { %s1880_s7 = scalar_lea.vmem %s2331_s17, 256  ;;  %p1888_p5 = scmp.lt.s32.totalorder %s2331_s17, %s2331_s17 }
  0x2f   : > { %p1881_p13 = scmp.ne.s32.totalorder %s2331_s17, %s1880_s7  ;;  %p1889_p4 = scmp.lt.s32.totalorder %s1880_s7, %s1880_s7 }
  0x31   : > { %p1883_p0 = pnand %p1881_p13, %p2353_p8  ;;  %p1890_p7 = por %p1889_p4, %p1888_p5 }
  0x33   : > { %p1884_p3 = pneg %p1883_p0 }
  0x35   : > { %p1891_p9 = pnand %p1890_p7, %p1884_p3 }
  0x37   : > { %1894 = shalt.err (!%p1891_p9)
}
  0x38   : > { %s2204_s8 = smov 64   ;;  %s2205_s23 = smov 4  }
  0x39   : > { %1687 = dma.hbm_to_vmem [thread:$0]  (!%p2337_p6), %s2871_s1, 256, %s2331_s17, [#allocation7], %s2204_s8, %s2204_s8, %s2205_s23  }
  0x3a   : > { %s2873_s3 = sld [smem:[#allocation29_spill]] }
  0x40   : > { %s1895_s7 = scalar_lea.hbm %s2873_s3, 256 }
  0x41   : > { %p1896_p4 = scmp.ne.s32.totalorder %s2873_s3, %s1895_s7  ;;  %p1902_p12 = scmp.lt.u32.totalorder %s1895_s7, %s2873_s3 }
  0x43   : > { %p1898_p10 = pnand %p1896_p4, %p2353_p8 }
  0x45   : > { %p1899_p11 = pneg %p1898_p10 }
  0x47   : > { %p1904_p13 = pnand %p1902_p12, %p1899_p11 }
  0x49   : > { %1907 = shalt.err (!%p1904_p13)
}
  0x4a   : > { %s1908_s17 = scalar_lea.vmem %s2341_s20, 256  ;;  %p1916_p7 = scmp.lt.s32.totalorder %s2341_s20, %s2341_s20 }
  0x4b   : > { %p1909_p0 = scmp.ne.s32.totalorder %s2341_s20, %s1908_s17  ;;  %p1917_p9 = scmp.lt.s32.totalorder %s1908_s17, %s1908_s17 }
  0x4d   : > { %p1911_p3 = pnand %p1909_p0, %p2353_p8  ;;  %p1918_p4 = por %p1917_p9, %p1916_p7 }
  0x4f   : > { %p1912_p5 = pneg %p1911_p3 }
  0x51   : > { %p1919_p10 = pnand %p1918_p4, %p1912_p5 }
  0x53   : > { %1922 = shalt.err (!%p1919_p10)
}
  0x54   : > { %1693 = dma.hbm_to_vmem [thread:$0]  (!%p2337_p6), %s2873_s3, 256, %s2341_s20, [#allocation10], %s2204_s8, %s2204_s8, %s2205_s23  }
  0x55   : > { %s1923_s12 = scalar_lea.hbm %s2845_s5, 256 }
  0x56   : > { %p1924_p11 = scmp.ne.s32.totalorder %s2845_s5, %s1923_s12  ;;  %p1930_p0 = scmp.lt.u32.totalorder %s1923_s12, %s2845_s5 }
  0x58   : > { %p1926_p12 = pnand %p1924_p11, %p2353_p8 }
  0x5a   : > { %p1927_p13 = pneg %p1926_p12 }
  0x5c   : > { %p1932_p3 = pnand %p1930_p0, %p1927_p13 }
  0x5e   : > { %1935 = shalt.err (!%p1932_p3)
}
  0x5f   : > { %s1936_s20 = scalar_lea.vmem %s2343_s22, 256  ;;  %p1944_p4 = scmp.lt.s32.totalorder %s2343_s22, %s2343_s22 }
  0x60   : > { %p1937_p5 = scmp.ne.s32.totalorder %s2343_s22, %s1936_s20  ;;  %p1945_p10 = scmp.lt.s32.totalorder %s1936_s20, %s1936_s20 }
  0x62   : > { %p1939_p7 = pnand %p1937_p5, %p2353_p8  ;;  %p1946_p11 = por %p1945_p10, %p1944_p4 }
  0x64   : > { %p1940_p9 = pneg %p1939_p7 }
  0x66   : > { %p1947_p12 = pnand %p1946_p11, %p1940_p9 }
  0x68   : > { %1950 = shalt.err (!%p1947_p12)
}
  0x69   : > { %1699 = dma.hbm_to_vmem [thread:$0]  (!%p2337_p6), %s2845_s5, 256, %s2343_s22, [#allocation13], %s2204_s8, %s2204_s8, %s2205_s23  }
  0x6a   : > { %s2206_s24 = smov [#allocation8]   ;;  %s2207_s15 = smov [#allocation11]  }
  0x6b   : > { %s249_s14 = sshll.u32 %s2206_s24, 4  ;;  %s273_s12 = sshll.u32 %s2207_s15, 4  ;;  %s250_s14 = int_to_ptr.vmem [resolvable:$true] %s249_s14  ;;  %s2429_s12 = int_to_ptr.vmem [resolvable:$true] %s273_s12 }
  0x6c   : > { %s2874_s2 = sld [smem:[#allocation28_spill]] }
  0x72   : > { %s1951_s21 = scalar_lea.hbm %s2874_s2, 16 }
  0x73   : > { %p1952_p13 = scmp.ne.s32.totalorder %s2874_s2, %s1951_s21  ;;  %p1958_p5 = scmp.lt.u32.totalorder %s1951_s21, %s2874_s2 }
  0x75   : > { %p1954_p0 = pnand %p1952_p13, %p2353_p8 }
  0x77   : > { %p1955_p3 = pneg %p1954_p0 }
  0x79   : > { %p1960_p7 = pnand %p1958_p5, %p1955_p3 }
  0x7b   : > { %1963 = shalt.err (!%p1960_p7)
}
  0x7c   : > { %s1964_s8 = scalar_lea.vmem %s250_s14, 16  ;;  %s1971_s23 = scalar_lea.vmem %s250_s14, 32 }
  0x7d   : > { %p1965_p9 = scmp.ne.s32.totalorder %s250_s14, %s1964_s8  ;;  %p1972_p11 = scmp.lt.s32.totalorder %s250_s14, %s250_s14 }
  0x7e   : > { %p1973_p12 = scmp.lt.s32.totalorder %s1971_s23, %s1964_s8 }
  0x7f   : > { %p1967_p4 = pnand %p1965_p9, %p2353_p8 }
  0x80   : > { %p1974_p2 = por %p1973_p12, %p1972_p11 }
  0x81   : > { %p1968_p10 = pneg %p1967_p4 }
  0x83   : > { %p1975_p1 = pnand %p1974_p2, %p1968_p10 }
  0x85   : > { %1978 = shalt.err (!%p1975_p1)
}
  0x86   : > { %1690 = dma.hbm_to_vmem [thread:$0]  (!%p2337_p6), %s2874_s2, 16, %s250_s14, [#allocation7]  }
  0x87   : > { %s1979_s19 = scalar_lea.hbm %s2844_s4, 16 }
  0x88   : > { %p1980_p13 = scmp.ne.s32.totalorder %s2844_s4, %s1979_s19  ;;  %p1986_p1 = scmp.lt.u32.totalorder %s1979_s19, %s2844_s4 }
  0x8a   : > { %p1982_p0 = pnand %p1980_p13, %p2353_p8 }
  0x8c   : > { %p1983_p3 = pneg %p1982_p0 }
  0x8e   : > { %p1988_p2 = pnand %p1986_p1, %p1983_p3 }
  0x90   : > { %1991 = shalt.err (!%p1988_p2)
}
  0x91   : > { %s1992_s14 = scalar_lea.vmem %s2429_s12, 16  ;;  %s1999_s22 = scalar_lea.vmem %s2429_s12, 32 }
  0x92   : > { %p1993_p5 = scmp.ne.s32.totalorder %s2429_s12, %s1992_s14  ;;  %p2000_p4 = scmp.lt.s32.totalorder %s2429_s12, %s2429_s12 }
  0x93   : > { %p2001_p10 = scmp.lt.s32.totalorder %s1999_s22, %s1992_s14 }
  0x94   : > { %p1995_p7 = pnand %p1993_p5, %p2353_p8 }
  0x95   : > { %p2002_p11 = por %p2001_p10, %p2000_p4 }
  0x96   : > { %p1996_p9 = pneg %p1995_p7 }
  0x98   : > { %p2003_p12 = pnand %p2002_p11, %p1996_p9 }
  0x9a   : > { %2006 = shalt.err (!%p2003_p12)
}
  0x9b   : > { %1696 = dma.hbm_to_vmem [thread:$0]  (!%p2337_p6), %s2844_s4, 16, %s2429_s12, [#allocation10]  }
  0x9c   : > { %s2208_s0 = smov [#allocation14]   ;;  %s2007_s19 = scalar_lea.hbm %s2846_s6, 16 }
  0x9d   : > { %s297_s24 = sshll.u32 %s2208_s0, 4  ;;  %p2008_p13 = scmp.ne.s32.totalorder %s2846_s6, %s2007_s19  ;;  %s298_s24 = int_to_ptr.vmem [resolvable:$true] %s297_s24 }
  0x9e   : > { %p2014_p1 = scmp.lt.u32.totalorder %s2007_s19, %s2846_s6 }
  0x9f   : > { %p2010_p0 = pnand %p2008_p13, %p2353_p8 }
  0xa1   : > { %p2011_p3 = pneg %p2010_p0 }
  0xa3   : > { %p2016_p2 = pnand %p2014_p1, %p2011_p3 }
  0xa5   : > { %2019 = shalt.err (!%p2016_p2)
}
  0xa6   : > { %s2020_s12 = scalar_lea.vmem %s298_s24, 16  ;;  %s2027_s14 = scalar_lea.vmem %s298_s24, 32 }
  0xa7   : > { %p2021_p5 = scmp.ne.s32.totalorder %s298_s24, %s2020_s12  ;;  %p2028_p4 = scmp.lt.s32.totalorder %s298_s24, %s298_s24 }
  0xa8   : > { %p2029_p10 = scmp.lt.s32.totalorder %s2027_s14, %s2020_s12 }
  0xa9   : > { %p2023_p7 = pnand %p2021_p5, %p2353_p8 }
  0xaa   : > { %p2030_p11 = por %p2029_p10, %p2028_p4 }
  0xab   : > { %p2024_p9 = pneg %p2023_p7 }
  0xad   : > { %p2031_p12 = pnand %p2030_p11, %p2024_p9 }
  0xaf   : > { %2034 = shalt.err (!%p2031_p12)
}
  0xb0   : > { %1702 = dma.hbm_to_vmem [thread:$0]  (!%p2337_p6), %s2846_s6, 16, %s298_s24, [#allocation13]  }
  0xb1   : > { %s1461_s30 = sadd.s32 4294967294, %s2199_s11   ;;  %s35_s18 = sadd.s32 1, %s2191_s9 }
  0xb2   : > { %s2875_s23 = sld [smem:[#allocation21_spill]]  ;;  %s38_s0 = sadd.s32 1, %s2195_s10 }
  0xb3   : > { %p36_p8 = scmp.ge.s32.totalorder %s35_s18, 2  ;;  %s45_s15 = sadd.s32 1, %s2179_s29 }
  0xb4   : > { %p52_p13 = scmp.ne.s32.totalorder %s2179_s29, %s2175_s28  ;;  %p53_p0 = scmp.eq.s32.totalorder %s2199_s11, 0 }
  0xb5   : > { %s2906_s18 = smov (%p36_p8, %s35_s18), 0  ;;  %s2876_s16 = sld [smem:[#allocation24_spill]] }
  0xb6   : > { %s2908_s0 = smov (!%p36_p8, %s38_s0), %s2195_s10  ;;  %p2501_p3 = por %p53_p0, %p52_p13 }
  0xb7   : > { %p58_p6 = scmp.ne.s32.totalorder %s2175_s28, %s2171_s27  ;;  %p40_p1 = scmp.ge.s32.totalorder %s2908_s0, 2 }
  0xb8   : > { %s195_s19 = ssub.s32 %s2191_s9, %s2906_s18  ;;  %p2878_p2 = scmp.ne.s32.totalorder %s2865_s13, 0 }
  0xb9   : > { %s199_s7 = sadd.s32 1, %s2167_s26  ;;  %s2910_s0 = smov (%p40_p1, %s2908_s0), 0 }
  0xba   : > { %p2511_p5 = por %p2878_p2, %p58_p6  ;;  %p209_p7 = scmp.ne.s32.totalorder %s2167_s26, %s2163_s25 }
  0xbb   : > { %p215_p9 = scmp.ne.s32.totalorder %s2163_s25, %s2875_s23  ;;  %s42_s20 = ssub.s32 %s2195_s10, %s2910_s0 }
  0xbc   : > { %p216_p4 = scmp.eq.s32.totalorder %s1461_s30, 3  ;;  %p43_p10 = scmp.eq.s32.totalorder %s42_s20, 0 }
  0xbd   : > { %s196_s27 = sor.u32 %s195_s19, %s42_s20  ;;  %p2880_p12 = scmp.ne.s32.totalorder %s2876_s16, 0 }
  0xbe   : > { %p197_p11 = scmp.eq.s32.totalorder %s196_s27, 0  ;;  %p2536_p13 = por %p216_p4, %p215_p9 }
  0xbf   : > { %p2526_p8 = por %p2880_p12, %p209_p7  ;;  %p1717_p0 = scmp.lt.s32.totalorder %s2199_s11, 4 }
  0xc0   : > { %s2531_s12 = scalar_select %p43_p10, %s2179_s29, %s45_s15  }
  0xc1   : > { %s2881_s17 = scalar_select %p2526_p8, 1, 0 }
  0xc2   : > { %s2534_s14 = scalar_select %p197_p11, %s2167_s26, %s199_s7  }
  0xc3   : > { %s2882_s22 = scalar_select %p2536_p13, 1, 0 }
  0xc4   : > { %s308_s8 = sand.u32 1, %s2179_s29   ;;  %s1512_s23 = sshll.u32 %s2195_s10, 9 }
  0xc5   : > { %s1470_s30 = sshll.u32 %s308_s8, 5  ;;  %s2883_s20 = sld [smem:[#allocation26_spill]] }
  0xc6   : > { %s312_s15 = scalar_lea.vmem [#allocation3], %s1470_s30  ;;  %p2550_p6 = pnand %p1717_p0, %p2501_p3 }
  0xc7   : > { %s319_s7 = sshll.u32 %s312_s15, 4  ;;  %s2556_s2 = scalar_lea.sflag [#allocation4], %s308_s8  ;;  %s2554_s7 = int_to_ptr.vmem [resolvable:$true] %s319_s7 }
  0xc8   : > { %p2037_p2 = pneg %p2550_p6 }
  0xcb   : > { %s2546_s16 = scalar_lea.hbm %s2883_s20, %s1512_s23  ;;  %s2040_s30 = scalar_lea.hbm %s2883_s20, 1024 }
  0xcc   : > { %s2035_s1 = scalar_lea.hbm %s2546_s16, 512  ;;  %p2041_p3 = scmp.lt.u32.totalorder %s2546_s16, %s2883_s20 }
  0xcd   : > { %p2036_p1 = scmp.ne.s32.totalorder %s2546_s16, %s2035_s1  ;;  %p2042_p4 = scmp.lt.u32.totalorder %s2040_s30, %s2035_s1 }
  0xce   : > { %p2044_p11 = scmp.lt.u32.totalorder %s2035_s1, %s2546_s16 }
  0xcf   : > { %p2038_p7 = pnand %p2037_p2, %p2036_p1  ;;  %p2043_p10 = por %p2042_p4, %p2041_p3 }
  0xd1   : > { %p2039_p9 = pneg %p2038_p7  ;;  %p2045_p12 = por %p2044_p11, %p2043_p10 }
  0xd3   : > { %p2046_p0 = pnand %p2045_p12, %p2039_p9 }
  0xd5   : > { %2049 = shalt.err (!%p2046_p0)
}
  0xd6   : > { %s2050_s8 = scalar_lea.vmem %s2554_s7, 512  ;;  %s2209_s23 = smov [#allocation3]  }
  0xd7   : > { %p2051_p1 = scmp.ne.s32.totalorder %s2554_s7, %s2050_s8  ;;  %s2055_s24 = sshll.u32 %s2209_s23, 4  ;;  %s2056_s24 = int_to_ptr.vmem [resolvable:$false] %s2055_s24 }
  0xd8   : > { %s2057_s19 = scalar_lea.vmem %s2056_s24, 1024  ;;  %p2058_p8 = scmp.lt.s32.totalorder %s2554_s7, %s2056_s24 }
  0xd9   : > { %p2053_p7 = pnand %p2051_p1, %p2037_p2  ;;  %p2059_p3 = scmp.lt.s32.totalorder %s2057_s19, %s2050_s8 }
  0xdb   : > { %p2054_p13 = pneg %p2053_p7  ;;  %p2060_p4 = por %p2059_p3, %p2058_p8 }
  0xdd   : > { %p2061_p10 = pnand %p2060_p4, %p2054_p13 }
  0xdf   : > { %2064 = shalt.err (!%p2061_p10)
}
  0xe0   : > { %s2210_s1 = smov 128   ;;  %s2211_s30 = smov 8  }
  0xe1   : > { %1706 = dma.hbm_to_vmem [thread:$0]  (!%p2550_p6), %s2546_s16, 512, %s2554_s7, %s2556_s2, %s2210_s1, %s2210_s1, %s2211_s30  }
  0xe2   : > { %s2885_s15 = sld [smem:[#allocation25_spill]] }
  0xe8   : > { %p2886_p2 = scmp.ne.s32.totalorder %s2885_s15, 0 }
  0xe9   : > { %s333_s23 = sand.u32 (!%p2886_p2), 1, %s2175_s28  }
  0xea   : > { %331 = sbr.rel (%p2886_p2) target bundleno = 3347 (0xd13), region = 48  ;;  %s1474_s3 = sshll.u32 (!%p2886_p2), %s333_s23, 5 }
  0xeb   : > { %s334_s24 = scalar_lea.sflag (!%p2886_p2), [#allocation4], %s333_s23  ;;  %s2587_s8 = scalar_lea.vmem (!%p2886_p2), [#allocation3], %s1474_s3 }
  0xf1   : > { %2138 = dma.done.wait (%p2511_p5), %s334_s24, 512  }
  0xf2   : > { %2140 = vsyncadd (%p2511_p5), %s334_s24, 4294966784  ;;  %p2887_p8 = scmp.ne.s32.totalorder %s2865_s13, 0 }
  0xf4   : > { %2142 = dma.done.wait (%p2887_p8), [#allocation7], 272  }
  0xf5   : > { %2144 = vsyncadd (%p2887_p8), [#allocation7], 4294967024 }
  0xf6   : > { %2146 = dma.done.wait (%p2887_p8), [#allocation10], 272  }
  0xf7   : > { %2148 = vsyncadd (%p2887_p8), [#allocation10], 4294967024 }
  0xf8   : > { %2150 = dma.done.wait (%p2887_p8), [#allocation13], 272  }
  0xf9   : > { %2152 = vsyncadd (%p2887_p8), [#allocation13], 4294967024  ;;  %s2888_s2 = sld [smem:[#allocation22_spill]]  ;;  %s389_s3 = sand.u32 1, %s2163_s25   ;;  %v2212_v0 = vmov 0.0   ;;  %vm2213_vm0 = vmmov 0  }
  0xfa   : > { %s1481_s21 = sshll.u32 %s389_s3, 4  ;;  %1552 = vmatprep.subr.bf16.mxu0 %v2212_v0  ;;  %1556 = vmatprep.mubr.msk.bf16.mxu0 %vm2213_vm0, %v2212_v0  ;;  %v1831_v1 = vld [vmem:[#allocation6] sm:$0xff]   ;;  %v1832_v2 = vld [vmem:[#allocation6 + $0x8] sm:$0xff]   ;;  %vm422_vm1 = vcmask 261120   ;;  %v1483_v6 = vld [vmem:[#allocation8] ss:$0 sm:$0xff] }
  0xfb   : > { %1553 = vmatpush3.bf16.msra.mxu0 %v1831_v1  ;;  %s2617_s13 = scalar_lea.vmem [#allocation15], %s1481_s21 }
  0xfc   : > { %1554 = vmatprep.subr.bf16.mxu0 %v2212_v0 }
  0xff   : > { %s1482_s16 = sshll.u32 %s2888_s2, 4  ;;  %1555 = vmatpush3.bf16.msra.mxu0 %v1832_v2  ;;  %p1487_p5 = scmp.ne.s32.totalorder %s2888_s2, 0 }
 0x100   : > { %s395_s7 = scalar_lea.vmem %s2587_s8, %s1482_s16 [#allocation3]  ;;  %v1833_v14 = vld [vmem:[#allocation9] sm:$0xff] (!%p1487_p5)   ;;  %v1834_v15 = vld [vmem:[#allocation9 + $0x8] sm:$0xff] (!%p1487_p5)   ;;  %v473_v17 = vld [vmem:[%s2587_s8 + $0x8] sm:$0xff] (!%p1487_p5)  ;;  %s2214_s27 = smov (!%p1487_p5), 96  }
 0x101   : > { %v396_v3 = vld [vmem:[%s395_s7] sm:$0xff]  ;;  %v397_v4 = vld [vmem:[%s395_s7 + $0x8] sm:$0xff]  ;;  %1560 = vmatprep.subr.bf16.mxu0 (!%p1487_p5), %v1833_v14  ;;  %v474_v19 = vld [vmem:[%s2587_s8 + $0x10] sm:$0xff] (!%p1487_p5) }
 0x102   : > { %v398_v5 = vpack.c.bf16 %v397_v4, %v396_v3  ;;  %v472_v16 = vld [vmem:[%s2587_s8] sm:$0xff] (!%p1487_p5)  ;;  %v475_v20 = vld [vmem:[%s2587_s8 + $0x18] sm:$0xff] (!%p1487_p5) }
 0x103   : > { %v476_v18 = vpack.c.bf16 (!%p1487_p5), %v473_v17, %v472_v16  ;;  %v477_v21 = vpack.c.bf16 (!%p1487_p5), %v475_v20, %v474_v19  ;;  %v1488_v23 = vld [vmem:[#allocation11] ss:$0 sm:$0xff] (!%p1487_p5) }
 0x104   : > { %1557 = vmatmul.mubr.msk.bf16.vlgmr.msra.gmra.mrb[0].mxu0 %vm422_vm1, %v398_v5 }
 0x105   : > { %1561 = vmatpush3.bf16.msra.mxu0 (!%p1487_p5), %v1833_v14  ;;  %1564 = vmatprep.mubr.msk.bf16.mxu0 (!%p1487_p5), %vm422_vm1, %v476_v18 }
 0x106   : > { %1562 = vmatprep.subr.bf16.mxu0 (!%p1487_p5), %v1834_v15 }
 0x109   : > { %1563 = vmatpush3.bf16.msra.mxu0 (!%p1487_p5), %v1834_v15 }
 0x1d6   : > { %471 = sbr.rel (%p1487_p5) target bundleno = 813 (0x32d), region = 80 }
 0x1d7   : > { %v460_v7 = vpop.f32.mrb[0].mxu0 }
 0x1d8   : > { %v1558_v8 = vpop.f32.mrb[1].mxu0  ;;  %v461_v10 = vadd.f32 %v1483_v6, %v460_v7 }
 0x1d9   : > { %v463_v9 = vpop.f32.mrb[2].mxu0 }
 0x1da   : > { %v464_v11 = vadd.f32 %v1483_v6, %v463_v9  ;;  %v1559_v12 = vpop.f32.mrb[3].mxu0  ;;  %1565 = vmatmul.mubr.msk.bf16.vlgmr.msra.gmra.mrb[0].mxu0 (!%p1487_p5), %vm422_vm1, %v477_v21 }
 0x1dc   : > { %v2615_v13 = vpack.c.bf16 %v464_v11, %v461_v10 }
 0x2ad   : > { %v1566_v22 = vpop.f32.mrb[0].mxu0 }
 0x2ae   : > { %v541_v24 = vpop.f32.mrb[1].mxu0  ;;  %v550_v26 = vadd.f32 %v1566_v22, %v1488_v23 }
 0x2af   : > { %v1567_v25 = vpop.f32.mrb[2].mxu0  ;;  %v542_v29 = vadd.f32 %v1488_v23, %v541_v24 }
 0x2b0   : > { %v553_v27 = vadd.f32 %v1567_v25, %v1488_v23  ;;  %v544_v28 = vpop.f32.mrb[3].mxu0 }
 0x2b1   : > { %v545_v30 = vadd.f32 %v1488_v23, %v544_v28 }
 0x2b2   : > { %v557_v31 = vpack.c.bf16 %v553_v27, %v550_v26 }
 0x2b3   : > { %v556_v32 = vpack.c.bf16 %v545_v30, %v542_v29 }
 0x2b4   : > { %559 = vst.msk [vmem:[#allocation2 + $0x8] sm:$0xff] %vm422_vm1, %v557_v31 }
 0x2b5   : > { %562 = vrot.lane.b32.xlu0 %v556_v32, %s2214_s27  ;;  %558 = vst.msk [vmem:[#allocation2] sm:$0xff] %vm422_vm1, %v556_v32 }
 0x2b9   : > { %564 = vrot.lane.b32.xlu0 %v557_v31, %s2214_s27 }
 0x327   : > { %v563_v33 = vpop.permute.xlu0 %562 }
 0x328   : > { %569 = vst.msk [vmem:[#allocation2 + $0x10] sm:$0xff] %vm422_vm1, %v563_v33 }
 0x32b   : > { %v565_v34 = vpop.permute.xlu0 %564 }
 0x32c   : > { %570 = vst.msk [vmem:[#allocation2 + $0x18] sm:$0xff] %vm422_vm1, %v565_v34 }
 0x32d PF: > { %1568 = vmatprep.subr.bf16.mxu0 %v2212_v0  ;;  %v2631_v35 = vld [vmem:[#allocation2] sm:$0xff]  ;;  %vm581_vm2 = vcmask 64512   ;;  %1572 = vmatprep.mubr.msk.bf16.mxu0 %vm2213_vm0, %v2212_v0  ;;  %v2641_v37 = vld [vmem:[#allocation2 + $0x8] sm:$0xff]  ;;  %s2215_s19 = smov 120   ;;  %vm838_vm3 = vcmask 1043456   ;;  %s2216_s1 = smov 112  }
 0x32e   : > { %v586_v36 = vsel %vm581_vm2, %v2631_v35, 0  ;;  %1576 = vmatprep.subr.bf16.mxu1 %v2212_v0  ;;  %1580 = vmatprep.mubr.msk.bf16.mxu1 %vm2213_vm0, %v2212_v0  ;;  %v589_v38 = vsel %vm581_vm2, %v2641_v37, 0  ;;  %v576_v6 = vld [vmem:[#allocation12] sm:$0xf]  ;;  %s2217_s30 = smov 104   ;;  %s2889_s15 = sld [smem:[#allocation22_spill]] }
 0x32f   : > { %1569 = vmatpush3.bf16.xpose.msra.mxu0 %v586_v36  ;;  %v2656_v55 = vld [vmem:[#allocation2 + $0x10] sm:$0xff]  ;;  %v887_v7 = vsel %vm838_vm3, %v576_v6, 0  ;;  %s2890_s23 = sld [smem:[#allocation23_spill]]  ;;  %s1314_s16 = sshll.u32 %s2617_s13, 4  ;;  %s2771_s16 = int_to_ptr.vmem [resolvable:$true] %s1314_s16 }
 0x330   : > { %1570 = vmatprep.subr.bf16.mxu0 %v2212_v0  ;;  %1577 = vmatpush3.bf16.msra.mxu1 %v2656_v55  ;;  %p2892_p6 = scmp.ne.s32.totalorder %s2881_s17, 0 }
 0x331   : > { %1578 = vmatprep.subr.bf16.mxu1 %v2212_v0 }
 0x333   : > { %v2660_v56 = vld [vmem:[#allocation2 + $0x18] sm:$0xff] }
 0x334   : > { %1579 = vmatpush3.bf16.msra.mxu1 %v2660_v56  ;;  %s1507_s24 = sshll.u32 %s2889_s15, 1  ;;  %s2065_s15 = scalar_lea.vmem %s2771_s16, 256 }
 0x335   : > { %1584 = vmatprep.subr.bf16.mxu1 %v2212_v0  ;;  %s1508_s8 = sshll.u32 %s2890_s23, 2  ;;  %p2066_p13 = scmp.ne.s32.totalorder %s2771_s16, %s2065_s15 }
 0x336   : > { %s1311_s2 = sadd.s32 %s1508_s8, %s1507_s24  ;;  %s2218_s23 = smov [#allocation15]  }
 0x337   : > { %1571 = vmatpush3.bf16.xpose.msra.mxu0 %v589_v38  ;;  %s1509_s21 = sshll.u32 %s1311_s2, 7  ;;  %p2067_p9 = pnand %p2066_p13, %p2892_p6 }
 0x338   : > { %1592 = vmatprep.subr.bf16.mxu0 %v2212_v0  ;;  %s2069_s24 = sshll.u32 %s2218_s23, 4  ;;  %s2070_s24 = int_to_ptr.vmem [resolvable:$false] %s2069_s24 }
 0x339   : > { %p2068_p11 = pneg %p2067_p9  ;;  %s2071_s8 = scalar_lea.vmem %s2070_s24, 512 }
 0x33a   : > { %p2072_p12 = scmp.lt.s32.totalorder %s2771_s16, %s2070_s24  ;;  %p2073_p0 = scmp.lt.s32.totalorder %s2071_s8, %s2065_s15 }
 0x33c   : > { %p2074_p1 = por %p2073_p0, %p2072_p12 }
 0x33e   : > { %1573 = vmatmul.mubr.msk.bf16.vlgmr.msra.gmra.mrb[0].mxu0 %vm581_vm2, %v2615_v13  ;;  %p2075_p7 = pnand %p2074_p1, %p2068_p11 }
 0x33f   : > { %1596 = vmatprep.mubr.msk.bf16.mxu0 %vm2213_vm0, %v2212_v0 }
 0x411   : > { %v625_v39 = vpop.f32.mrb[0].mxu0 }
 0x412   : > { %v1574_v40 = vpop.f32.mrb[1].mxu0  ;;  %v632_v41 = vsel %vm422_vm1, %v625_v39, -inf }
 0x413   : > { %633 = vmax.xlane.f32.xlu0 %v632_v41  ;;  %v628_v42 = vpop.f32.mrb[2].mxu0  ;;  %v577_v41 = vld [vmem:[#allocation12 + $0x4] sm:$0xf] }
 0x414   : > { %v1575_v43 = vpop.f32.mrb[3].mxu0  ;;  %v635_v44 = vsel %vm422_vm1, %v628_v42, -inf }
 0x417   : > { %636 = vmax.xlane.f32.xlu0 %v635_v44 }
 0x42d   : > { %705 = vrot.lane.b32.xlu0 %v2631_v35, %s2215_s19 }
 0x4a0   : > { %v634_v45 = vpop.xlane.xlu0 %633 }
 0x4a1   : > { %v638_v46 = vsub.f32 %v625_v39, %v634_v45 }
 0x4a3   : > { %v640_v47 = vmul.f32 1.442695, %v638_v46 }
 0x4a4   : > { %v637_v48 = vpop.xlane.xlu0 %636 }
 0x4a5   : > { %1835 = vpow2.f32 %v640_v47  ;;  %v639_v49 = vsub.f32 %v628_v42, %v637_v48 }
 0x4a7   : > { %v642_v50 = vmul.f32 1.442695, %v639_v49 }
 0x4a8   : > { %v706_v61 = vpop.permute.xlu0 %705 }
 0x4a9   : > { %1837 = vpow2.f32 %v642_v50  ;;  %v713_v1 = vsel %vm581_vm2, %v706_v61, 0 }
 0x4af   : > { %v1836_v51 = vpop.eup %1835 }
 0x4b0   : > { %v644_v52 = vsel %vm422_vm1, %v1836_v51, 0.0 }
 0x4b1   : > { %645 = vadd.xlane.f32.xlu1 %v644_v52 }
 0x4b3   : > { %v1838_v53 = vpop.eup %1837 }
 0x4b4   : > { %v647_v54 = vsel %vm422_vm1, %v1838_v53, 0.0 }
 0x4b5   : > { %648 = vadd.xlane.f32.xlu1 %v647_v54 }
 0x4c6   : > { %707 = vrot.lane.b32.xlu1 %v2641_v37, %s2215_s19 }
 0x4ca   : > { %701 = vrot.lane.b32.xlu1 %v2615_v13, %s2215_s19 }
 0x53e   : > { %v646_v57 = vpop.xlane.xlu1 %645 }
 0x53f   : > { %1839 = vrcp.f32 %v646_v57 }
 0x542   : > { %v649_v58 = vpop.xlane.xlu1 %648 }
 0x543   : > { %1841 = vrcp.f32 %v649_v58 }
 0x546   : > { %v708_v3 = vpop.permute.xlu1 %707 }
 0x547   : > { %v716_v4 = vsel %vm581_vm2, %v708_v3, 0 }
 0x549   : > { %v1840_v59 = vpop.eup %1839 }
 0x54a   : > { %v652_v62 = vmul.f32 %v1840_v59, %v1836_v51  ;;  %v702_v5 = vpop.permute.xlu1 %701 }
 0x54d   : > { %v1842_v60 = vpop.eup %1841 }
 0x54e   : > { %v653_v63 = vmul.f32 %v1842_v60, %v1838_v53 }
 0x550   : > { %v654_v2 = vpack.c.bf16 %v653_v63, %v652_v62 }
 0x552   : > { %1581 = vmatmul.mubr.msk.bf16.vlgmr.msra.gmra.mrb[0].mxu1 %vm422_vm1, %v654_v2 }
 0x553   : > { %1585 = vmatpush3.bf16.xpose.msra.mxu1 %v713_v1  ;;  %1588 = vmatprep.mubr.msk.bf16.mxu1 %vm2213_vm0, %v2212_v0 }
 0x554   : > { %1586 = vmatprep.subr.bf16.mxu1 %v2212_v0 }
 0x55b   : > { %1587 = vmatpush3.bf16.xpose.msra.mxu1 %v716_v4 }
 0x55c   : > { %1606 = vmatprep.subr.bf16.mxu1 %v2212_v0 }
 0x562   : > { %1589 = vmatmul.mubr.msk.bf16.vlgmr.msra.gmra.mrb[4].mxu1 %vm581_vm2, %v702_v5 }
 0x563   : > { %1608 = vmatprep.mubr.msk.bf16.mxu1 %vm2213_vm0, %v2212_v0  ;;  %1607 = vmatpush3.bf16.msra.mxu1 %v887_v7 }
 0x564   : > { %1620 = vmatprep.subr.bf16.mxu1 %v2212_v0 }
 0x625   : > { %v692_v8 = vpop.f32.mrb[0].mxu1 }
 0x626   : > { %v1582_v9 = vpop.f32.mrb[1].mxu1 }
 0x627   : > { %v695_v10 = vpop.f32.mrb[2].mxu1 }
 0x628   : > { %v699_v11 = vpack.c.bf16 %v695_v10, %v692_v8  ;;  %v1583_v12 = vpop.f32.mrb[3].mxu1 }
 0x62a   : > { %1609 = vmatmul.mubr.msk.bf16.vlgmr.msra.gmra.mrb[8].mxu1 %vm581_vm2, %v699_v11 }
 0x62b   : > { %1624 = vmatprep.mubr.msk.bf16.mxu1 %vm2213_vm0, %v2212_v0 }
 0x635   : > { %v752_v14 = vpop.f32.mrb[4].mxu1 }
 0x636   : > { %v1590_v15 = vpop.f32.mrb[5].mxu1  ;;  %v759_v16 = vsel %vm422_vm1, %v752_v14, -inf }
 0x637   : > { %760 = vmax.xlane.f32.xlu1 %v759_v16  ;;  %v755_v17 = vpop.f32.mrb[6].mxu1 }
 0x638   : > { %v1591_v18 = vpop.f32.mrb[7].mxu1  ;;  %v762_v19 = vsel %vm422_vm1, %v755_v17, -inf }
 0x639   : > { %763 = vmax.xlane.f32.xlu0 %v762_v19 }
 0x648   : > { %784 = vrot.lane.b32.xlu1 %v2656_v55, %s2215_s19 }
 0x64c   : > { %932 = vrot.lane.b32.xlu1 %v2631_v35, %s2216_s1 }
 0x650   : > { %934 = vrot.lane.b32.xlu1 %v2641_v37, %s2216_s1 }
 0x654   : > { %930 = vrot.lane.b32.xlu1 %v2615_v13, %s2216_s1 }
 0x658   : > { %1113 = vrot.lane.b32.xlu1 %v2641_v37, %s2217_s30 }
 0x6c4   : > { %v761_v20 = vpop.xlane.xlu1 %760 }
 0x6c5   : > { %v765_v21 = vsub.f32 %v752_v14, %v761_v20 }
 0x6c6   : > { %v764_v22 = vpop.xlane.xlu0 %763 }
 0x6c7   : > { %v767_v23 = vmul.f32 1.442695, %v765_v21  ;;  %v766_v24 = vsub.f32 %v755_v17, %v764_v22 }
 0x6c8   : > { %v785_v30 = vpop.permute.xlu1 %784 }
 0x6c9   : > { %1843 = vpow2.f32 %v767_v23  ;;  %v769_v25 = vmul.f32 1.442695, %v766_v24  ;;  %1593 = vmatpush3.bf16.msra.mxu0 %v785_v30 }
 0x6ca   : > { %1594 = vmatprep.subr.bf16.mxu0 %v2212_v0 }
 0x6cb   : > { %1845 = vpow2.f32 %v769_v25 }
 0x6cc   : > { %v933_v45 = vpop.permute.xlu1 %932 }
 0x6cd   : > { %v940_v49 = vsel %vm581_vm2, %v933_v45, 0 }
 0x6d0   : > { %v935_v51 = vpop.permute.xlu1 %934 }
 0x6d1   : > { %v943_v52 = vsel %vm581_vm2, %v935_v51, 0 }
 0x6d3   : > { %v1844_v26 = vpop.eup %1843 }
 0x6d4   : > { %v771_v27 = vsel %vm422_vm1, %v1844_v26, 0.0  ;;  %v931_v54 = vpop.permute.xlu1 %930 }
 0x6d5   : > { %v1846_v28 = vpop.eup %1845  ;;  %772 = vadd.xlane.f32.xlu0 %v771_v27 }
 0x6d6   : > { %v774_v29 = vsel %vm422_vm1, %v1846_v28, 0.0 }
 0x6d8   : > { %v1114_v58 = vpop.permute.xlu1 %1113 }
 0x6d9   : > { %775 = vadd.xlane.f32.xlu0 %v774_v29  ;;  %v1122_v59 = vsel %vm581_vm2, %v1114_v58, 0 }
 0x6ef   : > { %786 = vrot.lane.b32.xlu0 %v2660_v56, %s2215_s19  ;;  %s2891_s19 = sld [smem:[#allocation30_spill]] }
 0x6f3   : > { %1111 = vrot.lane.b32.xlu0 %v2631_v35, %s2217_s30 }
 0x6f7   : > { %1109 = vrot.lane.b32.xlu0 %v2615_v13, %s2217_s30  ;;  %v840_v13 = vsel %vm838_vm3, %v577_v41, 0 }
 0x6fd   : > { %v923_v31 = vpop.f32.mrb[8].mxu1 }
 0x6fe   : > { %v1610_v32 = vpop.f32.mrb[9].mxu1 }
 0x6ff   : > { %v926_v33 = vpop.f32.mrb[10].mxu1 }
 0x700   : > { %v1611_v34 = vpop.f32.mrb[11].mxu1 }
 0x762   : > { %v773_v36 = vpop.xlane.xlu0 %772 }
 0x763   : > { %1847 = vrcp.f32 %v773_v36 }
 0x766   : > { %v776_v38 = vpop.xlane.xlu0 %775 }
 0x767   : > { %1849 = vrcp.f32 %v776_v38 }
 0x76a   : > { %v787_v35 = vpop.permute.xlu0 %786 }
 0x76b   : > { %1595 = vmatpush3.bf16.msra.mxu0 %v787_v35 }
 0x76c   : > { %1600 = vmatprep.subr.bf16.mxu0 %v2212_v0 }
 0x76d   : > { %v1848_v39 = vpop.eup %1847 }
 0x76e   : > { %v779_v42 = vmul.f32 %v1848_v39, %v1844_v26  ;;  %v1112_v53 = vpop.permute.xlu0 %1111 }
 0x76f   : > { %v1119_v57 = vsel %vm581_vm2, %v1112_v53, 0 }
 0x771   : > { %v1850_v40 = vpop.eup %1849 }
 0x772   : > { %v780_v43 = vmul.f32 %v1850_v40, %v1846_v28  ;;  %v1110_v60 = vpop.permute.xlu0 %1109 }
 0x774   : > { %v781_v44 = vpack.c.bf16 %v780_v43, %v779_v42 }
 0x776   : > { %1597 = vmatmul.mubr.msk.bf16.vlgmr.msra.gmra.mrb[4].mxu0 %vm422_vm1, %v781_v44 }
 0x777   : > { %1601 = vmatpush3.bf16.msra.mxu0 %v840_v13  ;;  %1602 = vmatprep.mubr.msk.bf16.mxu0 %vm2213_vm0, %v2212_v0 }
 0x778   : > { %1612 = vmatprep.subr.bf16.mxu0 %v2212_v0 }
 0x849   : > { %v827_v37 = vpop.f32.mrb[4].mxu0 }
 0x84a   : > { %v1598_v46 = vpop.f32.mrb[5].mxu0 }
 0x84b   : > { %v830_v47 = vpop.f32.mrb[6].mxu0 }
 0x84c   : > { %v834_v48 = vpack.c.bf16 %v830_v47, %v827_v37  ;;  %v1599_v50 = vpop.f32.mrb[7].mxu0  ;;  %v578_v37 = vld [vmem:[#allocation12 + $0x8] sm:$0xf] }
 0x84d   : > { %v1064_v45 = vsel %vm838_vm3, %v578_v37, 0 }
 0x84e   : > { %1603 = vmatmul.mubr.msk.bf16.vlgmr.msra.gmra.mrb[8].mxu0 %vm581_vm2, %v834_v48 }
 0x84f   : > { %1613 = vmatpush3.bf16.xpose.msra.mxu0 %v940_v49  ;;  %1616 = vmatprep.mubr.msk.bf16.mxu0 %vm2213_vm0, %v2212_v0 }
 0x850   : > { %1614 = vmatprep.subr.bf16.mxu0 %v2212_v0 }
 0x857   : > { %1615 = vmatpush3.bf16.xpose.msra.mxu0 %v943_v52 }
 0x858   : > { %1634 = vmatprep.subr.bf16.mxu0 %v2212_v0 }
 0x85e   : > { %1617 = vmatmul.mubr.msk.bf16.vlgmr.msra.gmra.mrb[12].mxu0 %vm581_vm2, %v931_v54 }
 0x85f   : > { %1635 = vmatpush3.bf16.xpose.msra.mxu0 %v1119_v57  ;;  %1638 = vmatprep.mubr.msk.bf16.mxu0 %vm2213_vm0, %v2212_v0 }
 0x860   : > { %1636 = vmatprep.subr.bf16.mxu0 %v2212_v0 }
 0x867   : > { %1637 = vmatpush3.bf16.xpose.msra.mxu0 %v1122_v59 }
 0x86e   : > { %1639 = vmatmul.mubr.msk.bf16.vlgmr.msra.gmra.mrb[16].mxu0 %vm581_vm2, %v1110_v60 }
 0x921   : > { %v876_v61 = vpop.f32.mrb[8].mxu0 }
 0x922   : > { %v2724_v62 = vadd.f32 %v923_v31, %v876_v61  ;;  %v1604_v63 = vpop.f32.mrb[9].mxu0  ;;  %v579_v61 = vld [vmem:[#allocation12 + $0xc] sm:$0xf] }
 0x923   : > { %v879_v1 = vpop.f32.mrb[10].mxu0  ;;  %v1243_v63 = vsel %vm838_vm3, %v579_v61, 0 }
 0x924   : > { %v2726_v2 = vadd.f32 %v926_v33, %v879_v1  ;;  %v1605_v3 = vpop.f32.mrb[11].mxu0 }
 0x931   : > { %v979_v4 = vpop.f32.mrb[12].mxu0 }
 0x932   : > { %v1618_v5 = vpop.f32.mrb[13].mxu0  ;;  %v986_v6 = vsel %vm422_vm1, %v979_v4, -inf }
 0x933   : > { %987 = vmax.xlane.f32.xlu1 %v986_v6  ;;  %v982_v7 = vpop.f32.mrb[14].mxu0 }
 0x934   : > { %v1619_v8 = vpop.f32.mrb[15].mxu0  ;;  %v989_v9 = vsel %vm422_vm1, %v982_v7, -inf }
 0x935   : > { %990 = vmax.xlane.f32.xlu0 %v989_v9 }
 0x941   : > { %v1158_v10 = vpop.f32.mrb[16].mxu0 }
 0x942   : > { %v1640_v11 = vpop.f32.mrb[17].mxu0  ;;  %v1165_v12 = vsel %vm422_vm1, %v1158_v10, -inf }
 0x943   : > { %v1161_v14 = vpop.f32.mrb[18].mxu0 }
 0x944   : > { %1009 = vrot.lane.b32.xlu1 %v2656_v55, %s2216_s1  ;;  %v1641_v15 = vpop.f32.mrb[19].mxu0  ;;  %v1168_v32 = vsel %vm422_vm1, %v1161_v14, -inf }
 0x968   : > { %1166 = vmax.xlane.f32.xlu1 %v1165_v12 }
 0x9c0   : > { %v988_v16 = vpop.xlane.xlu1 %987 }
 0x9c1   : > { %v992_v17 = vsub.f32 %v979_v4, %v988_v16 }
 0x9c2   : > { %v991_v18 = vpop.xlane.xlu0 %990 }
 0x9c3   : > { %v994_v19 = vmul.f32 1.442695, %v992_v17  ;;  %v993_v20 = vsub.f32 %v982_v7, %v991_v18 }
 0x9c4   : > { %v1010_v21 = vpop.permute.xlu1 %1009 }
 0x9c5   : > { %1851 = vpow2.f32 %v994_v19  ;;  %v996_v22 = vmul.f32 1.442695, %v993_v20  ;;  %1621 = vmatpush3.bf16.msra.mxu1 %v1010_v21 }
 0x9c6   : > { %1622 = vmatprep.subr.bf16.mxu1 %v2212_v0 }
 0x9c7   : > { %1853 = vpow2.f32 %v996_v22 }
 0x9cf   : > { %v1852_v23 = vpop.eup %1851 }
 0x9d0   : > { %v998_v24 = vsel %vm422_vm1, %v1852_v23, 0.0 }
 0x9d1   : > { %v1854_v25 = vpop.eup %1853  ;;  %999 = vadd.xlane.f32.xlu0 %v998_v24 }
 0x9d2   : > { %v1001_v26 = vsel %vm422_vm1, %v1854_v25, 0.0 }
 0x9d5   : > { %1002 = vadd.xlane.f32.xlu0 %v1001_v26 }
 0x9eb   : > { %1011 = vrot.lane.b32.xlu0 %v2660_v56, %s2216_s1  ;;  %s2769_s1 = scalar_lea.hbm %s2891_s19, %s1509_s21 }
 0x9f5   : > { %v1167_v27 = vpop.xlane.xlu1 %1166 }
 0x9f6   : > { %v1171_v28 = vsub.f32 %v1158_v10, %v1167_v27 }
 0x9f8   : > { %v1173_v29 = vmul.f32 1.442695, %v1171_v28 }
 0x9fa   : > { %1855 = vpow2.f32 %v1173_v29 }
 0xa04   : > { %v1856_v30 = vpop.eup %1855 }
 0xa05   : > { %v1177_v31 = vsel %vm422_vm1, %v1856_v30, 0.0 }
 0xa06   : > { %1178 = vadd.xlane.f32.xlu1 %v1177_v31 }
 0xa0a   : > { %1169 = vmax.xlane.f32.xlu0 %v1168_v32 }
 0xa17   : > { %1188 = vrot.lane.b32.xlu1 %v2656_v55, %s2217_s30 }
 0xa5e   : > { %v1000_v33 = vpop.xlane.xlu0 %999 }
 0xa5f   : > { %1857 = vrcp.f32 %v1000_v33 }
 0xa62   : > { %v1003_v34 = vpop.xlane.xlu0 %1002 }
 0xa63   : > { %1859 = vrcp.f32 %v1003_v34 }
 0xa66   : > { %v1012_v36 = vpop.permute.xlu0 %1011 }
 0xa67   : > { %1623 = vmatpush3.bf16.msra.mxu1 %v1012_v36 }
 0xa68   : > { %1628 = vmatprep.subr.bf16.mxu1 %v2212_v0 }
 0xa69   : > { %v1858_v38 = vpop.eup %1857 }
 0xa6a   : > { %v1006_v39 = vmul.f32 %v1858_v38, %v1852_v23 }
 0xa6d   : > { %v1860_v35 = vpop.eup %1859 }
 0xa6e   : > { %v1007_v40 = vmul.f32 %v1860_v35, %v1854_v25 }
 0xa70   : > { %v1008_v41 = vpack.c.bf16 %v1007_v40, %v1006_v39 }
 0xa72   : > { %1625 = vmatmul.mubr.msk.bf16.vlgmr.msra.gmra.mrb[12].mxu1 %vm422_vm1, %v1008_v41 }
 0xa73   : > { %1630 = vmatprep.mubr.msk.bf16.mxu1 %vm2213_vm0, %v2212_v0  ;;  %1629 = vmatpush3.bf16.msra.mxu1 %v1064_v45 }
 0xa74   : > { %1642 = vmatprep.subr.bf16.mxu1 %v2212_v0 }
 0xa93   : > { %v1179_v47 = vpop.xlane.xlu1 %1178 }
 0xa97   : > { %v1170_v42 = vpop.xlane.xlu0 %1169  ;;  %v1189_v53 = vpop.permute.xlu1 %1188 }
 0xa98   : > { %v1172_v55 = vsub.f32 %v1161_v14, %v1170_v42 }
 0xa9a   : > { %v1175_v43 = vmul.f32 1.442695, %v1172_v55 }
 0xa9c   : > { %1861 = vpow2.f32 %v1175_v43 }
 0xaa6   : > { %v1862_v44 = vpop.eup %1861 }
 0xaa7   : > { %v1180_v13 = vsel %vm422_vm1, %v1862_v44, 0.0 }
 0xaa8   : > { %1181 = vadd.xlane.f32.xlu0 %v1180_v13 }
 0xabe   : > { %1190 = vrot.lane.b32.xlu0 %v2660_v56, %s2217_s30  ;;  %s2779_s30 = scalar_lea.sflag [#allocation5], %s389_s3 }
 0xb35   : > { %v1182_v46 = vpop.xlane.xlu0 %1181 }
 0xb36   : > { %1863 = vrcp.f32 %v1182_v46 }
 0xb37   : > { %1865 = vrcp.f32 %v1179_v47 }
 0xb39   : > { %v1191_v56 = vpop.permute.xlu0 %1190 }
 0xb40   : > { %v1864_v54 = vpop.eup %1863 }
 0xb41   : > { %v1866_v57 = vpop.eup %1865  ;;  %v1186_v58 = vmul.f32 %v1864_v54, %v1862_v44 }
 0xb42   : > { %v1185_v59 = vmul.f32 %v1866_v57, %v1856_v30 }
 0xb44   : > { %v1187_v60 = vpack.c.bf16 %v1186_v58, %v1185_v59 }
 0xb45   : > { %v1052_v48 = vpop.f32.mrb[12].mxu1 }
 0xb46   : > { %v1626_v49 = vpop.f32.mrb[13].mxu1 }
 0xb47   : > { %v1055_v50 = vpop.f32.mrb[14].mxu1 }
 0xb48   : > { %v1059_v51 = vpack.c.bf16 %v1055_v50, %v1052_v48  ;;  %v1627_v52 = vpop.f32.mrb[15].mxu1 }
 0xb4a   : > { %1631 = vmatmul.mubr.msk.bf16.vlgmr.msra.gmra.mrb[16].mxu1 %vm581_vm2, %v1059_v51 }
 0xb4b   : > { %1643 = vmatpush3.bf16.msra.mxu1 %v1189_v53  ;;  %1646 = vmatprep.mubr.msk.bf16.mxu1 %vm2213_vm0, %v2212_v0 }
 0xb4c   : > { %1644 = vmatprep.subr.bf16.mxu1 %v2212_v0 }
 0xb4f   : > { %1645 = vmatpush3.bf16.msra.mxu1 %v1191_v56 }
 0xb50   : > { %1650 = vmatprep.subr.bf16.mxu1 %v2212_v0 }
 0xb52   : > { %1647 = vmatmul.mubr.msk.bf16.vlgmr.msra.gmra.mrb[20].mxu1 %vm422_vm1, %v1187_v60 }
 0xb53   : > { %1652 = vmatprep.mubr.msk.bf16.mxu1 %vm2213_vm0, %v2212_v0  ;;  %1651 = vmatpush3.bf16.msra.mxu1 %v1243_v63 }
 0xc1d   : > { %v1100_v1 = vpop.f32.mrb[16].mxu1 }
 0xc1e   : > { %v1107_v3 = vadd.f32 %v1100_v1, %v2724_v62  ;;  %v1632_v4 = vpop.f32.mrb[17].mxu1  ;;  %v1505_v62 = vld [vmem:[#allocation14] ss:$0 sm:$0xff] }
 0xc1f   : > { %v1103_v5 = vpop.f32.mrb[18].mxu1 }
 0xc20   : > { %v1108_v6 = vadd.f32 %v1103_v5, %v2726_v2  ;;  %v1633_v7 = vpop.f32.mrb[19].mxu1 }
 0xc25   : > { %v1231_v8 = vpop.f32.mrb[20].mxu1 }
 0xc26   : > { %v1648_v9 = vpop.f32.mrb[21].mxu1 }
 0xc27   : > { %v1234_v10 = vpop.f32.mrb[22].mxu1 }
 0xc28   : > { %v1238_v11 = vpack.c.bf16 %v1234_v10, %v1231_v8  ;;  %v1649_v0 = vpop.f32.mrb[23].mxu1 }
 0xc2a   : > { %1653 = vmatmul.mubr.msk.bf16.vlgmr.msra.gmra.mrb[24].mxu1 %vm581_vm2, %v1238_v11 }
 0xcfd   : > { %v1279_v12 = vpop.f32.mrb[24].mxu1 }
 0xcfe   : > { %v1286_v14 = vadd.f32 %v1279_v12, %v1107_v3  ;;  %v1654_v2 = vpop.f32.mrb[25].mxu1 }
 0xcff   : > { %v1282_v15 = vpop.f32.mrb[26].mxu1 }
 0xd00   : > { %v1294_v16 = vadd.f32 %v1505_v62, %v1286_v14  ;;  %v1287_v17 = vadd.f32 %v1282_v15, %v1108_v6  ;;  %v1655_v18 = vpop.f32.mrb[27].mxu1 }
 0xd02   : > { %1296 = vst.msk [vmem:[%s2617_s13] sm:$0xff] %vm422_vm1, %v1294_v16  ;;  %v1295_v19 = vadd.f32 %v1505_v62, %v1287_v17 }
 0xd04   : > { %1297 = vst.msk [vmem:[%s2617_s13 + $0x8] sm:$0xff] %vm422_vm1, %v1295_v19 }
 0xd05   : > { %2078 = shalt.err (!%p2075_p7)
}
 0xd06   : > { %s2079_s3 = scalar_lea.hbm %s2769_s1, 256  ;;  %s2083_s21 = scalar_lea.hbm %s2891_s19, 1024 }
 0xd07   : > { %p2080_p3 = scmp.ne.s32.totalorder %s2769_s1, %s2079_s3  ;;  %p2084_p2 = scmp.lt.u32.totalorder %s2769_s1, %s2891_s19 }
 0xd08   : > { %p2085_p8 = scmp.lt.u32.totalorder %s2083_s21, %s2079_s3  ;;  %p2087_p13 = scmp.lt.u32.totalorder %s2079_s3, %s2769_s1 }
 0xd09   : > { %p2081_p4 = pnand %p2080_p3, %p2892_p6 }
 0xd0a   : > { %p2086_p5 = por %p2085_p8, %p2084_p2 }
 0xd0b   : > { %p2082_p10 = pneg %p2081_p4 }
 0xd0c   : > { %p2088_p9 = por %p2087_p13, %p2086_p5 }
 0xd0e   : > { %p2089_p11 = pnand %p2088_p9, %p2082_p10 }
 0xd10   : > { %2092 = shalt.err (!%p2089_p11)
}
 0xd11   : > { %s2219_s15 = smov 128   ;;  %s2220_s23 = smov 8  }
 0xd12   : > { %1682 = dma.vmem_to_hbm [thread:$0]  (%p2892_p6), %s2771_s16, 256, %s2769_s1, %s2779_s30, %s2219_s15, %s2219_s15, %s2220_s23  }
 0xd13 PF: > { %s2893_s24 = sld [smem:[#allocation21_spill]]  ;;  %p1724_p12 = scmp.ge.s32.totalorder %s2199_s11, 2 }
 0xd14   : > { %p2894_p0 = scmp.ne.s32.totalorder %s2882_s22, 0 }
 0xd16   : > { %p1708_p1 = pnand %p1724_p12, %p2894_p0 }
 0xd19   : > { %s1329_s8 = sand.u32 1, %s2893_s24  }
 0xd1a   : > { %s1330_s3 = scalar_lea.sflag [#allocation5], %s1329_s8 }
 0xd1b   : > { %2154 = dma.done.wait (!%p1708_p1), %s1330_s3, 256  }
 0xd1c   : > { %2156 = vsyncadd (!%p1708_p1), %s1330_s3, 4294967040  ;;  %s26_s11 = sadd.s32 1, %s2199_s11   ;;  %s2895_s24 = smov %s2163_s25 }
 0xd1d   : > { %p23_p7 = scmp.ge.s32.totalorder %s26_s11, 6   ;;  %s2896_s25 = smov %s2167_s26 }
 0xd1e   : > { %s2897_s26 = smov %s2534_s14  ;;  %s2898_s27 = smov %s2175_s28 }
 0xd1f   : > { %s2899_s28 = smov %s2179_s29  ;;  %s2900_s29 = smov %s2531_s12 }
 0xd20   : > { %s2901_s30 = smov %s2191_s9  ;;  %s2902_s8 = smov %s2195_s10 }
 0xd21   : > { %s2903_s9 = smov %s2906_s18  ;;  %s2904_s10 = smov %s2910_s0 }
 0xd22   :  { %25 = sbr.rel (!%p23_p7) target bundleno = 18 (0x12), region = 124 }
 0xd29   :  { %1335 = vsyncpa [#allocation4], 1 }
 0xd2a   :  { %1337 = vsyncpa [#allocation4 + $0x1], 1 }
 0xd2b   :  { %1338 = vsyncpa [#allocation7], 1 }
 0xd2c   :  { %1339 = vsyncpa [#allocation10], 1 }
 0xd2d   :  { %1340 = vsyncpa [#allocation13], 1 }
 0xd2e   :  { %1341 = vsyncpa [#allocation5], 1 }
 0xd2f   :  { %1343 = vsyncpa [#allocation5 + $0x1], 1 }

</bundles_post_ra>
